<compile_context>
chip_gen: v7x
topology: tpu7x:2x2x1
jax: 0.10.0
libtpu: 0.0.40
codegen_flags: <defaults>
</compile_context>

<pallas_src>
from functools import partial

import jax
import jax.numpy as jnp
from jax import lax
from jax.experimental import pallas as pl
from jax.experimental.pallas import tpu as pltpu


def _round_up(x, m):
    return (x + m - 1) // m * m


# --------------------------------------------------------------------------- kernel
def _eiie_kernel(x_ref, k1_ref, b1_ref, k2_ref, b2_ref, k3_ref, bl_ref, out_ref):
    """x_ref: (A*tb, FTp) rows = (asset, batch-within-block); out_ref: (tb, OUTp)."""
    num_assets = k3_ref.shape[0]
    tb, outp = out_ref.shape
    cdt = k1_ref.dtype                       # MXU input dtype (bf16 or f32)
    f32 = jnp.float32

    x = x_ref[...]                                                   # (A*tb, FTp)

    # conv1 (1x3, zero pad 1 along time) + ReLU, as one banded matmul.
    h1 = jnp.dot(x, k1_ref[...], preferred_element_type=f32) + b1_ref[...]
    h1 = jnp.maximum(h1, 0.0)

    # conv2 (1 x time_window) + ReLU, as one matmul collapsing the time axis.
    h2 = jnp.dot(h1.astype(cdt), k2_ref[...], preferred_element_type=f32) + b2_ref[...]
    h2 = jnp.maximum(h2, 0.0).astype(cdt)                            # (A*tb, C2p)

    # flatten + linear: rows are asset-major, so each asset's rows are a contiguous,
    # 32-aligned sublane slice; accumulate per-asset matmuls (same FLOPs as fused).
    acc = jnp.zeros((tb, outp), f32)
    for a in range(num_assets):                                      # static unroll
        acc = acc + jnp.dot(h2[a * tb:(a + 1) * tb, :], k3_ref[a],
                            preferred_element_type=f32)
    logits = acc + bl_ref[...]           # pad lanes biased to -1e30 -> softmax == 0

    # softmax over lanes (lane-dense (tb, 128) store; padding lanes come out 0).
    m = jnp.max(logits, axis=1, keepdims=True)
    e = jnp.exp(logits - m)
    s = jnp.sum(e, axis=1, keepdims=True)
    if cdt == jnp.float32:
        out_ref[...] = e / s
    else:
        out_ref[...] = e * pl.reciprocal(s, approx=True)


# ----------------------------------------------------------------- parameter prep
def prepare_params(params, dtype=jnp.bfloat16):
    """One-time re-layout of PyTorch-shaped EIIE parameters into lane-aligned,
    zero-padded matmul operands (runs once, off the per-step path)."""
    w1, b1, w2, b2, wl, bl = (jnp.asarray(p, jnp.float32) for p in params)
    C1, F, _, KW = w1.shape                    # conv1.weight: (2, F, 1, 3)
    C2, _, _, T = w2.shape                     # conv2.weight: (20, C1, 1, T)
    A = wl.shape[0] - 1                        # linear.weight: (A+1, 20*A)
    FT, C1T = F * T, C1 * T
    FTp, C1Tp = _round_up(FT, 128), _round_up(C1T, 128)
    C2p, OUTp = _round_up(C2, 128), _round_up(A + 1, 128)

    # K1[f*T + t_in, c*T + t_out] = w1[c, f, 0, t_in - t_out + 1]  (3-tap band; the
    # band's zero boundary reproduces Conv2d's (0,1) zero padding along time).
    w1s = w1.reshape(C1, F, KW)
    tt = jnp.arange(T)
    delta = tt[:, None] - tt[None, :] + 1                      # [t_in, t_out]
    valid = (delta >= 0) & (delta < KW)
    band = jnp.where(valid[None, None],
                     w1s[:, :, jnp.clip(delta, 0, KW - 1)], 0.0)    # [c, f, t_in, t_out]
    k1 = band.transpose(1, 2, 0, 3).reshape(FT, C1T)                # [(f,t_in), (c,t_out)]
    k1 = jnp.zeros((FTp, C1Tp), jnp.float32).at[:FT, :C1T].set(k1)
    b1w = jnp.zeros((1, C1Tp), jnp.float32).at[0, :C1T].set(jnp.repeat(b1, T))

    # K2[c*T + t, c2] = w2[c2, c, 0, t]
    k2 = w2.reshape(C2, C1 * T).T
    k2 = jnp.zeros((C1Tp, C2p), jnp.float32).at[:C1T, :C2].set(k2)
    b2w = jnp.zeros((1, C2p), jnp.float32).at[0, :C2].set(b2)

    # K3[a, c2, o] = wl[o, c2*A + a]   (PyTorch flatten order is c2*A + a)
    k3 = wl.reshape(A + 1, C2, A).transpose(2, 1, 0)                # [a, c2, o]
    k3p = jnp.zeros((A, C2p, OUTp), jnp.float32).at[:, :C2, :A + 1].set(k3)
    # Padding lanes get a huge negative bias so their softmax output is exactly 0.
    blw = jnp.full((1, OUTp), -1e30, jnp.float32).at[0, :A + 1].set(bl)

    return (k1.astype(dtype), b1w, k2.astype(dtype), b2w, k3p.astype(dtype), blw)


# ----------------------------------------------------------------- batch blocking
def _choose_tb(batch, n_assets, ftp, itemsize):
    """Batch block (multiple of 32, <=256) sized against a VMEM budget for the
    double-buffered activation slab; >=2 grid steps when the batch allows (v7x)."""
    row_bytes = n_assets * ftp * itemsize
    cap = max(32, min(256, ((8 << 20) // (2 * max(row_bytes, 1))) // 32 * 32))
    tb = min(cap, _round_up(batch, 32))
    if batch > 32 and tb >= batch:           # force >=2 parallel grid steps
        tb = _round_up((batch + 1) // 2, 32)
    return tb


# ------------------------------------------------------------------------ forward
@partial(jax.jit, static_argnames=("single_buffer_weights",))
def eiie_forward(state, last_action, prepared, single_buffer_weights=True):
    """state: (B, F, A, T) float32 (NCHW, as in PyTorch). last_action is unused
    (EIIE.forward ignores it). `prepared` comes from prepare_params()."""
    del last_action                          # not used by the PyTorch forward
    k1, b1w, k2, b2w, k3, blw = prepared
    B, F, A, T = state.shape
    FT = F * T
    FTp, C1Tp = k1.shape
    C2p = k2.shape[1]
    OUTp = k3.shape[2]
    dtype = k1.dtype
    itemsize = jnp.dtype(dtype).itemsize

    tb = _choose_tb(B, A, FTp, itemsize)
    nb = (B + tb - 1) // tb
    Bp = nb * tb
    rows = A * tb

    # (B, F, A, T) -> rows ordered (batch-block, asset, batch-within-block),
    # columns (f, t), zero-padded to lane width.  One permute/copy in the wrapper;
    # all weight re-layout already happened in prepare_params().
    x = state.astype(jnp.float32).transpose(2, 0, 1, 3).reshape(A, B, FT)
    x = jnp.pad(x, ((0, 0), (0, Bp - B), (0, FTp - FT)))
    x = x.reshape(A, nb, tb, FTp).transpose(1, 0, 2, 3).reshape(nb * rows, FTp)
    x = x.astype(dtype)

    def w_spec(arr):
        idx = lambda i, _n=arr.ndim: (0,) * _n        # grid-invariant: fetched once
        if single_buffer_weights:
            return pl.BlockSpec(arr.shape, idx,
                                pipeline_mode=pl.Buffered(buffer_count=1))
        return pl.BlockSpec(arr.shape, idx)

    # Explicit VMEM budget: x block (x2) + weights + intermediates + out block (x2).
    wbytes = (k1.size + k2.size + k3.size) * itemsize + (b1w.size + b2w.size + blw.size) * 4
    wbytes *= 1 if single_buffer_weights else 2
    est = (2 * rows * FTp * itemsize                      # activation block, dbl-buffered
           + wbytes
           + rows * (C1Tp + C2p) * (4 + itemsize)         # h1/h2 f32 + bf16 copies
           + tb * OUTp * 4                                # accumulator
           + 2 * tb * OUTp * 4)                           # output block, dbl-buffered
    vmem_limit = int(min(max(2 * est + (2 << 20), 16 << 20), 64 << 20))

    out = pl.pallas_call(
        _eiie_kernel,
        out_shape=jax.ShapeDtypeStruct((Bp, OUTp), jnp.float32),
        grid=(nb,),
        in_specs=[
            pl.BlockSpec((rows, FTp), lambda i: (i, 0)),  # activations, blocked on batch
            w_spec(k1), w_spec(b1w), w_spec(k2), w_spec(b2w), w_spec(k3), w_spec(blw),
        ],
        out_specs=pl.BlockSpec((tb, OUTp), lambda i: (i, 0)),   # lane-dense output slab
        compiler_params=pltpu.CompilerParams(
            dimension_semantics=("parallel",),
            vmem_limit_bytes=vmem_limit,
        ),
    )(x, k1, b1w, k2, b2w, k3, blw)

    return out[:B, :A + 1]


# ---------------------------------------------------------------------- reference
def eiie_reference(state, last_action, params):
    """Pure-JAX reference mirroring the PyTorch forward exactly."""
    del last_action
    w1, b1, w2, b2, wl, bl = params
    x = lax.conv_general_dilated(state, w1, (1, 1), ((0, 0), (1, 1)),
                                 dimension_numbers=('NCHW', 'OIHW', 'NCHW'))
    x = jnp.maximum(x + b1[None, :, None, None], 0.0)
    x = lax.conv_general_dilated(x, w2, (1, 1), ((0, 0), (0, 0)),
                                 dimension_numbers=('NCHW', 'OIHW', 'NCHW'))
    x = jnp.maximum(x + b2[None, :, None, None], 0.0)
    x = x.reshape(x.shape[0], -1)              # flatten: index c2*A + a
    logits = x @ wl.T + bl
    return jax.nn.softmax(logits, axis=1)


# --------------------------------------------------------------------------- test
if __name__ == "__main__":
    # small, module-consistent shapes: batch=2, num_features=4, num_assets=8, time_window=16
    B, F, A, T = 2, 4, 8, 16
    C1, C2 = 2, 20

    key = jax.random.PRNGKey(0)
    ks = jax.random.split(key, 8)
    state = jax.random.normal(ks[0], (B, F, A, T), jnp.float32)
    last_action = jax.random.normal(ks[1], (B, A + 1), jnp.float32)   # unused by forward

    # deterministic synthetic parameters (PyTorch shapes)
    w1 = 0.1 * jax.random.normal(ks[2], (C1, F, 1, 3), jnp.float32)   # conv1.weight
    b1 = 0.1 * jax.random.normal(ks[3], (C1,), jnp.float32)           # conv1.bias
    w2 = 0.1 * jax.random.normal(ks[4], (C2, C1, 1, T), jnp.float32)  # conv2.weight
    b2 = 0.1 * jax.random.normal(ks[5], (C2,), jnp.float32)           # conv2.bias
    wl = 0.1 * jax.random.normal(ks[6], (A + 1, C2 * A), jnp.float32) # linear.weight
    bl = 0.1 * jax.random.normal(ks[7], (A + 1,), jnp.float32)        # linear.bias
    params = (w1, b1, w2, b2, wl, bl)

    ref = jax.block_until_ready(eiie_reference(state, last_action, params))

    def run(prepared):
        try:
            return jax.block_until_ready(eiie_forward(state, last_action, prepared))
        except Exception:
            # Fallback if this jax build rejects pipeline_mode=pl.Buffered(1).
            return jax.block_until_ready(
                eiie_forward(state, last_action, prepared, single_buffer_weights=False))

    # f32 weights: tight numerical check against the PyTorch-equivalent reference.
    out_f32 = run(prepare_params(params, dtype=jnp.float32))
    assert out_f32.shape == (B, A + 1)
    assert jnp.allclose(out_f32, ref, rtol=1e-4, atol=2e-5), (out_f32, ref)

    # bf16 weights (default deployment path for the v6e/v7x MXU): looser tolerance.
    out_bf16 = run(prepare_params(params, dtype=jnp.bfloat16))
    assert out_bf16.shape == (B, A + 1)
    assert jnp.allclose(out_bf16, ref, rtol=5e-2, atol=1e-2), (out_bf16, ref)

    print("KERNEL_OK")
</pallas_src>

<mosaic_0001>
module attributes {stable_mosaic.version = 11 : i64} {
  func.func @_eiie_kernel(%arg0: i32, %arg1: memref<256x128xf32, #tpu.memory_space<vmem>>, %arg2: memref<128x128xf32, #tpu.memory_space<vmem>>, %arg3: memref<1x128xf32, #tpu.memory_space<vmem>>, %arg4: memref<128x128xf32, #tpu.memory_space<vmem>>, %arg5: memref<1x128xf32, #tpu.memory_space<vmem>>, %arg6: memref<8x128x128xf32, #tpu.memory_space<vmem>>, %arg7: memref<1x128xf32, #tpu.memory_space<vmem>>, %arg8: memref<32x128xf32, #tpu.memory_space<vmem>>) attributes {dimension_semantics = [#tpu.dimension_semantics<parallel>], iteration_bounds = array<i64: 1>, scalar_prefetch = 0 : i64, scratch_operands = 0 : i64, tpu.core_type = #tpu.core_type<tc>, window_params = [{transform_indices = @transform_0, window_bounds = array<i64: 256, 128>}, {pipeline_mode = #tpu.pipeline_mode<synchronous>, transform_indices = @transform_1, window_bounds = array<i64: 128, 128>}, {pipeline_mode = #tpu.pipeline_mode<synchronous>, transform_indices = @transform_2, window_bounds = array<i64: 1, 128>}, {pipeline_mode = #tpu.pipeline_mode<synchronous>, transform_indices = @transform_3, window_bounds = array<i64: 128, 128>}, {pipeline_mode = #tpu.pipeline_mode<synchronous>, transform_indices = @transform_4, window_bounds = array<i64: 1, 128>}, {pipeline_mode = #tpu.pipeline_mode<synchronous>, transform_indices = @transform_5, window_bounds = array<i64: 8, 128, 128>}, {pipeline_mode = #tpu.pipeline_mode<synchronous>, transform_indices = @transform_6, window_bounds = array<i64: 1, 128>}, {transform_indices = @transform_7, window_bounds = array<i64: 32, 128>}]} {
    %c0 = arith.constant 0 : index
    %c0_0 = arith.constant 0 : index
    %0 = vector.load %arg1[%c0, %c0_0] : memref<256x128xf32, #tpu.memory_space<vmem>>, vector<256x128xf32>
    %c0_1 = arith.constant 0 : index
    %c0_2 = arith.constant 0 : index
    %1 = vector.load %arg2[%c0_1, %c0_2] : memref<128x128xf32, #tpu.memory_space<vmem>>, vector<128x128xf32>
    %cst = arith.constant dense<0.000000e+00> : vector<256x128xf32>
    %2 = tpu.matmul %0, %1, %cst {dimension_numbers = #tpu.dot_dimension_numbers<[1], [0], [0], [1], [0, 0, 1, 1], [], []>} : vector<256x128xf32>, vector<128x128xf32>, vector<256x128xf32> -> vector<256x128xf32>
    %c0_3 = arith.constant 0 : index
    %c0_4 = arith.constant 0 : index
    %3 = vector.load %arg3[%c0_3, %c0_4] : memref<1x128xf32, #tpu.memory_space<vmem>>, vector<1x128xf32>
    %4 = vector.broadcast %3 : vector<1x128xf32> to vector<256x128xf32>
    %5 = arith.addf %2, %4 : vector<256x128xf32>
    %cst_5 = arith.constant 0.000000e+00 : f32
    %6 = vector.broadcast %cst_5 : f32 to vector<256x128xf32>
    %7 = arith.maximumf %5, %6 : vector<256x128xf32>
    %c0_6 = arith.constant 0 : index
    %c0_7 = arith.constant 0 : index
    %8 = vector.load %arg4[%c0_6, %c0_7] : memref<128x128xf32, #tpu.memory_space<vmem>>, vector<128x128xf32>
    %cst_8 = arith.constant dense<0.000000e+00> : vector<256x128xf32>
    %9 = tpu.matmul %7, %8, %cst_8 {dimension_numbers = #tpu.dot_dimension_numbers<[1], [0], [0], [1], [0, 0, 1, 1], [], []>} : vector<256x128xf32>, vector<128x128xf32>, vector<256x128xf32> -> vector<256x128xf32>
    %c0_9 = arith.constant 0 : index
    %c0_10 = arith.constant 0 : index
    %10 = vector.load %arg5[%c0_9, %c0_10] : memref<1x128xf32, #tpu.memory_space<vmem>>, vector<1x128xf32>
    %11 = vector.broadcast %10 : vector<1x128xf32> to vector<256x128xf32>
    %12 = arith.addf %9, %11 : vector<256x128xf32>
    %cst_11 = arith.constant 0.000000e+00 : f32
    %13 = vector.broadcast %cst_11 : f32 to vector<256x128xf32>
    %14 = arith.maximumf %12, %13 : vector<256x128xf32>
    %cst_12 = arith.constant 0.000000e+00 : f32
    %15 = vector.broadcast %cst_12 : f32 to vector<32x128xf32>
    %16 = vector.extract_strided_slice %14 {offsets = [0, 0], sizes = [32, 128], strides = [1, 1]} : vector<256x128xf32> to vector<32x128xf32>
    %c0_13 = arith.constant 0 : index
    %c0_14 = arith.constant 0 : index
    %c0_15 = arith.constant 0 : index
    %17 = vector.load %arg6[%c0_13, %c0_14, %c0_15] : memref<8x128x128xf32, #tpu.memory_space<vmem>>, vector<1x128x128xf32>
    %18 = vector.shape_cast %17 : vector<1x128x128xf32> to vector<128x128xf32>
    %cst_16 = arith.constant dense<0.000000e+00> : vector<32x128xf32>
    %19 = tpu.matmul %16, %18, %cst_16 {dimension_numbers = #tpu.dot_dimension_numbers<[1], [0], [0], [1], [0, 0, 1, 1], [], []>} : vector<32x128xf32>, vector<128x128xf32>, vector<32x128xf32> -> vector<32x128xf32>
    %20 = arith.addf %15, %19 : vector<32x128xf32>
    %21 = vector.extract_strided_slice %14 {offsets = [32, 0], sizes = [32, 128], strides = [1, 1]} : vector<256x128xf32> to vector<32x128xf32>
    %c1 = arith.constant 1 : index
    %c0_17 = arith.constant 0 : index
    %c0_18 = arith.constant 0 : index
    %22 = vector.load %arg6[%c1, %c0_17, %c0_18] : memref<8x128x128xf32, #tpu.memory_space<vmem>>, vector<1x128x128xf32>
    %23 = vector.shape_cast %22 : vector<1x128x128xf32> to vector<128x128xf32>
    %cst_19 = arith.constant dense<0.000000e+00> : vector<32x128xf32>
    %24 = tpu.matmul %21, %23, %cst_19 {dimension_numbers = #tpu.dot_dimension_numbers<[1], [0], [0], [1], [0, 0, 1, 1], [], []>} : vector<32x128xf32>, vector<128x128xf32>, vector<32x128xf32> -> vector<32x128xf32>
    %25 = arith.addf %20, %24 : vector<32x128xf32>
    %26 = vector.extract_strided_slice %14 {offsets = [64, 0], sizes = [32, 128], strides = [1, 1]} : vector<256x128xf32> to vector<32x128xf32>
    %c2 = arith.constant 2 : index
    %c0_20 = arith.constant 0 : index
    %c0_21 = arith.constant 0 : index
    %27 = vector.load %arg6[%c2, %c0_20, %c0_21] : memref<8x128x128xf32, #tpu.memory_space<vmem>>, vector<1x128x128xf32>
    %28 = vector.shape_cast %27 : vector<1x128x128xf32> to vector<128x128xf32>
    %cst_22 = arith.constant dense<0.000000e+00> : vector<32x128xf32>
    %29 = tpu.matmul %26, %28, %cst_22 {dimension_numbers = #tpu.dot_dimension_numbers<[1], [0], [0], [1], [0, 0, 1, 1], [], []>} : vector<32x128xf32>, vector<128x128xf32>, vector<32x128xf32> -> vector<32x128xf32>
    %30 = arith.addf %25, %29 : vector<32x128xf32>
    %31 = vector.extract_strided_slice %14 {offsets = [96, 0], sizes = [32, 128], strides = [1, 1]} : vector<256x128xf32> to vector<32x128xf32>
    %c3 = arith.constant 3 : index
    %c0_23 = arith.constant 0 : index
    %c0_24 = arith.constant 0 : index
    %32 = vector.load %arg6[%c3, %c0_23, %c0_24] : memref<8x128x128xf32, #tpu.memory_space<vmem>>, vector<1x128x128xf32>
    %33 = vector.shape_cast %32 : vector<1x128x128xf32> to vector<128x128xf32>
    %cst_25 = arith.constant dense<0.000000e+00> : vector<32x128xf32>
    %34 = tpu.matmul %31, %33, %cst_25 {dimension_numbers = #tpu.dot_dimension_numbers<[1], [0], [0], [1], [0, 0, 1, 1], [], []>} : vector<32x128xf32>, vector<128x128xf32>, vector<32x128xf32> -> vector<32x128xf32>
    %35 = arith.addf %30, %34 : vector<32x128xf32>
    %36 = vector.extract_strided_slice %14 {offsets = [128, 0], sizes = [32, 128], strides = [1, 1]} : vector<256x128xf32> to vector<32x128xf32>
    %c4 = arith.constant 4 : index
    %c0_26 = arith.constant 0 : index
    %c0_27 = arith.constant 0 : index
    %37 = vector.load %arg6[%c4, %c0_26, %c0_27] : memref<8x128x128xf32, #tpu.memory_space<vmem>>, vector<1x128x128xf32>
    %38 = vector.shape_cast %37 : vector<1x128x128xf32> to vector<128x128xf32>
    %cst_28 = arith.constant dense<0.000000e+00> : vector<32x128xf32>
    %39 = tpu.matmul %36, %38, %cst_28 {dimension_numbers = #tpu.dot_dimension_numbers<[1], [0], [0], [1], [0, 0, 1, 1], [], []>} : vector<32x128xf32>, vector<128x128xf32>, vector<32x128xf32> -> vector<32x128xf32>
    %40 = arith.addf %35, %39 : vector<32x128xf32>
    %41 = vector.extract_strided_slice %14 {offsets = [160, 0], sizes = [32, 128], strides = [1, 1]} : vector<256x128xf32> to vector<32x128xf32>
    %c5 = arith.constant 5 : index
    %c0_29 = arith.constant 0 : index
    %c0_30 = arith.constant 0 : index
    %42 = vector.load %arg6[%c5, %c0_29, %c0_30] : memref<8x128x128xf32, #tpu.memory_space<vmem>>, vector<1x128x128xf32>
    %43 = vector.shape_cast %42 : vector<1x128x128xf32> to vector<128x128xf32>
    %cst_31 = arith.constant dense<0.000000e+00> : vector<32x128xf32>
    %44 = tpu.matmul %41, %43, %cst_31 {dimension_numbers = #tpu.dot_dimension_numbers<[1], [0], [0], [1], [0, 0, 1, 1], [], []>} : vector<32x128xf32>, vector<128x128xf32>, vector<32x128xf32> -> vector<32x128xf32>
    %45 = arith.addf %40, %44 : vector<32x128xf32>
    %46 = vector.extract_strided_slice %14 {offsets = [192, 0], sizes = [32, 128], strides = [1, 1]} : vector<256x128xf32> to vector<32x128xf32>
    %c6 = arith.constant 6 : index
    %c0_32 = arith.constant 0 : index
    %c0_33 = arith.constant 0 : index
    %47 = vector.load %arg6[%c6, %c0_32, %c0_33] : memref<8x128x128xf32, #tpu.memory_space<vmem>>, vector<1x128x128xf32>
    %48 = vector.shape_cast %47 : vector<1x128x128xf32> to vector<128x128xf32>
    %cst_34 = arith.constant dense<0.000000e+00> : vector<32x128xf32>
    %49 = tpu.matmul %46, %48, %cst_34 {dimension_numbers = #tpu.dot_dimension_numbers<[1], [0], [0], [1], [0, 0, 1, 1], [], []>} : vector<32x128xf32>, vector<128x128xf32>, vector<32x128xf32> -> vector<32x128xf32>
    %50 = arith.addf %45, %49 : vector<32x128xf32>
    %51 = vector.extract_strided_slice %14 {offsets = [224, 0], sizes = [32, 128], strides = [1, 1]} : vector<256x128xf32> to vector<32x128xf32>
    %c7 = arith.constant 7 : index
    %c0_35 = arith.constant 0 : index
    %c0_36 = arith.constant 0 : index
    %52 = vector.load %arg6[%c7, %c0_35, %c0_36] : memref<8x128x128xf32, #tpu.memory_space<vmem>>, vector<1x128x128xf32>
    %53 = vector.shape_cast %52 : vector<1x128x128xf32> to vector<128x128xf32>
    %cst_37 = arith.constant dense<0.000000e+00> : vector<32x128xf32>
    %54 = tpu.matmul %51, %53, %cst_37 {dimension_numbers = #tpu.dot_dimension_numbers<[1], [0], [0], [1], [0, 0, 1, 1], [], []>} : vector<32x128xf32>, vector<128x128xf32>, vector<32x128xf32> -> vector<32x128xf32>
    %55 = arith.addf %50, %54 : vector<32x128xf32>
    %c0_38 = arith.constant 0 : index
    %c0_39 = arith.constant 0 : index
    %56 = vector.load %arg7[%c0_38, %c0_39] : memref<1x128xf32, #tpu.memory_space<vmem>>, vector<1x128xf32>
    %57 = vector.broadcast %56 : vector<1x128xf32> to vector<32x128xf32>
    %58 = arith.addf %55, %57 : vector<32x128xf32>
    %cst_40 = arith.constant dense<0xFF800000> : vector<32xf32>
    %59 = vector.multi_reduction <maximumf>, %58, %cst_40 [1] : vector<32x128xf32> to vector<32xf32>
    %60 = vector.shape_cast %59 : vector<32xf32> to vector<32x1xf32>
    %61 = vector.broadcast %60 : vector<32x1xf32> to vector<32x128xf32>
    %62 = arith.subf %58, %61 : vector<32x128xf32>
    %63 = math.exp %62 : vector<32x128xf32>
    %cst_41 = arith.constant dense<0.000000e+00> : vector<32xf32>
    %64 = vector.multi_reduction <add>, %63, %cst_41 [1] : vector<32x128xf32> to vector<32xf32>
    %65 = vector.shape_cast %64 : vector<32xf32> to vector<32x1xf32>
    %66 = vector.broadcast %65 : vector<32x1xf32> to vector<32x128xf32>
    %67 = arith.divf %63, %66 : vector<32x128xf32>
    %c0_42 = arith.constant 0 : index
    %c0_43 = arith.constant 0 : index
    %68 = vector.load %arg8[%c0_42, %c0_43] : memref<32x128xf32, #tpu.memory_space<vmem>>, vector<32x128xf32>
    tpu.vector_store %arg8[%c0_42, %c0_43], %67 {strides = array<i32>} : memref<32x128xf32, #tpu.memory_space<vmem>>, vector<32x128xf32>,
    return
  }
  func.func @transform_0(%arg0: i32) -> (i32, i32) {
    %c0_i32 = arith.constant 0 : i32
    %c0_i32_0 = arith.constant 0 : i32
    return %arg0, %c0_i32 : i32, i32
  }
  func.func @transform_1(%arg0: i32) -> (i32, i32) {
    %c0_i32 = arith.constant 0 : i32
    %c0_i32_0 = arith.constant 0 : i32
    %c0_i32_1 = arith.constant 0 : i32
    return %c0_i32, %c0_i32_0 : i32, i32
  }
  func.func @transform_2(%arg0: i32) -> (i32, i32) {
    %c0_i32 = arith.constant 0 : i32
    %c0_i32_0 = arith.constant 0 : i32
    %c0_i32_1 = arith.constant 0 : i32
    return %c0_i32, %c0_i32_0 : i32, i32
  }
  func.func @transform_3(%arg0: i32) -> (i32, i32) {
    %c0_i32 = arith.constant 0 : i32
    %c0_i32_0 = arith.constant 0 : i32
    %c0_i32_1 = arith.constant 0 : i32
    return %c0_i32, %c0_i32_0 : i32, i32
  }
  func.func @transform_4(%arg0: i32) -> (i32, i32) {
    %c0_i32 = arith.constant 0 : i32
    %c0_i32_0 = arith.constant 0 : i32
    %c0_i32_1 = arith.constant 0 : i32
    return %c0_i32, %c0_i32_0 : i32, i32
  }
  func.func @transform_5(%arg0: i32) -> (i32, i32, i32) {
    %c0_i32 = arith.constant 0 : i32
    %c0_i32_0 = arith.constant 0 : i32
    %c0_i32_1 = arith.constant 0 : i32
    %c0_i32_2 = arith.constant 0 : i32
    return %c0_i32, %c0_i32_0, %c0_i32_1 : i32, i32, i32
  }
  func.func @transform_6(%arg0: i32) -> (i32, i32) {
    %c0_i32 = arith.constant 0 : i32
    %c0_i32_0 = arith.constant 0 : i32
    %c0_i32_1 = arith.constant 0 : i32
    return %c0_i32, %c0_i32_0 : i32, i32
  }
  func.func @transform_7(%arg0: i32) -> (i32, i32) {
    %c0_i32 = arith.constant 0 : i32
    %c0_i32_0 = arith.constant 0 : i32
    return %arg0, %c0_i32 : i32, i32
  }
}

module attributes {stable_mosaic.version = 11 : i64} {
  func.func @_eiie_kernel(%arg0: i32, %arg1: memref<256x128xf32, #tpu.memory_space<vmem>>, %arg2: memref<128x128xf32, #tpu.memory_space<vmem>>, %arg3: memref<1x128xf32, #tpu.memory_space<vmem>>, %arg4: memref<128x128xf32, #tpu.memory_space<vmem>>, %arg5: memref<1x128xf32, #tpu.memory_space<vmem>>, %arg6: memref<8x128x128xf32, #tpu.memory_space<vmem>>, %arg7: memref<1x128xf32, #tpu.memory_space<vmem>>, %arg8: memref<32x128xf32, #tpu.memory_space<vmem>>) attributes {dimension_semantics = [#tpu.dimension_semantics<parallel>], iteration_bounds = array<i64: 1>, scalar_prefetch = 0 : i64, scratch_operands = 0 : i64, tpu.core_type = #tpu.core_type<tc>, window_params = [{transform_indices = @transform_0, window_bounds = array<i64: 256, 128>}, {pipeline_mode = #tpu.pipeline_mode<synchronous>, transform_indices = @transform_1, window_bounds = array<i64: 128, 128>}, {pipeline_mode = #tpu.pipeline_mode<synchronous>, transform_indices = @transform_2, window_bounds = array<i64: 1, 128>}, {pipeline_mode = #tpu.pipeline_mode<synchronous>, transform_indices = @transform_3, window_bounds = array<i64: 128, 128>}, {pipeline_mode = #tpu.pipeline_mode<synchronous>, transform_indices = @transform_4, window_bounds = array<i64: 1, 128>}, {pipeline_mode = #tpu.pipeline_mode<synchronous>, transform_indices = @transform_5, window_bounds = array<i64: 8, 128, 128>}, {pipeline_mode = #tpu.pipeline_mode<synchronous>, transform_indices = @transform_6, window_bounds = array<i64: 1, 128>}, {transform_indices = @transform_7, window_bounds = array<i64: 32, 128>}]} {
    %c0 = arith.constant 0 : index
    %c0_0 = arith.constant 0 : index
    %0 = vector.load %arg1[%c0, %c0_0] : memref<256x128xf32, #tpu.memory_space<vmem>>, vector<256x128xf32>
    %c0_1 = arith.constant 0 : index
    %c0_2 = arith.constant 0 : index
    %1 = vector.load %arg2[%c0_1, %c0_2] : memref<128x128xf32, #tpu.memory_space<vmem>>, vector<128x128xf32>
    %cst = arith.constant dense<0.000000e+00> : vector<256x128xf32>
    %2 = tpu.matmul %0, %1, %cst {dimension_numbers = #tpu.dot_dimension_numbers<[1], [0], [0], [1], [0, 0, 1, 1], [], []>} : vector<256x128xf32>, vector<128x128xf32>, vector<256x128xf32> -> vector<256x128xf32>
    %c0_3 = arith.constant 0 : index
    %c0_4 = arith.constant 0 : index
    %3 = vector.load %arg3[%c0_3, %c0_4] : memref<1x128xf32, #tpu.memory_space<vmem>>, vector<1x128xf32>
    %4 = vector.broadcast %3 : vector<1x128xf32> to vector<256x128xf32>
    %5 = arith.addf %2, %4 : vector<256x128xf32>
    %cst_5 = arith.constant 0.000000e+00 : f32
    %6 = vector.broadcast %cst_5 : f32 to vector<256x128xf32>
    %7 = arith.maximumf %5, %6 : vector<256x128xf32>
    %c0_6 = arith.constant 0 : index
    %c0_7 = arith.constant 0 : index
    %8 = vector.load %arg4[%c0_6, %c0_7] : memref<128x128xf32, #tpu.memory_space<vmem>>, vector<128x128xf32>
    %cst_8 = arith.constant dense<0.000000e+00> : vector<256x128xf32>
    %9 = tpu.matmul %7, %8, %cst_8 {dimension_numbers = #tpu.dot_dimension_numbers<[1], [0], [0], [1], [0, 0, 1, 1], [], []>} : vector<256x128xf32>, vector<128x128xf32>, vector<256x128xf32> -> vector<256x128xf32>
    %c0_9 = arith.constant 0 : index
    %c0_10 = arith.constant 0 : index
    %10 = vector.load %arg5[%c0_9, %c0_10] : memref<1x128xf32, #tpu.memory_space<vmem>>, vector<1x128xf32>
    %11 = vector.broadcast %10 : vector<1x128xf32> to vector<256x128xf32>
    %12 = arith.addf %9, %11 : vector<256x128xf32>
    %cst_11 = arith.constant 0.000000e+00 : f32
    %13 = vector.broadcast %cst_11 : f32 to vector<256x128xf32>
    %14 = arith.maximumf %12, %13 : vector<256x128xf32>
    %cst_12 = arith.constant 0.000000e+00 : f32
    %15 = vector.broadcast %cst_12 : f32 to vector<32x128xf32>
    %16 = vector.extract_strided_slice %14 {offsets = [0, 0], sizes = [32, 128], strides = [1, 1]} : vector<256x128xf32> to vector<32x128xf32>
    %c0_13 = arith.constant 0 : index
    %c0_14 = arith.constant 0 : index
    %c0_15 = arith.constant 0 : index
    %17 = vector.load %arg6[%c0_13, %c0_14, %c0_15] : memref<8x128x128xf32, #tpu.memory_space<vmem>>, vector<1x128x128xf32>
    %18 = vector.shape_cast %17 : vector<1x128x128xf32> to vector<128x128xf32>
    %cst_16 = arith.constant dense<0.000000e+00> : vector<32x128xf32>
    %19 = tpu.matmul %16, %18, %cst_16 {dimension_numbers = #tpu.dot_dimension_numbers<[1], [0], [0], [1], [0, 0, 1, 1], [], []>} : vector<32x128xf32>, vector<128x128xf32>, vector<32x128xf32> -> vector<32x128xf32>
    %20 = arith.addf %15, %19 : vector<32x128xf32>
    %21 = vector.extract_strided_slice %14 {offsets = [32, 0], sizes = [32, 128], strides = [1, 1]} : vector<256x128xf32> to vector<32x128xf32>
    %c1 = arith.constant 1 : index
    %c0_17 = arith.constant 0 : index
    %c0_18 = arith.constant 0 : index
    %22 = vector.load %arg6[%c1, %c0_17, %c0_18] : memref<8x128x128xf32, #tpu.memory_space<vmem>>, vector<1x128x128xf32>
    %23 = vector.shape_cast %22 : vector<1x128x128xf32> to vector<128x128xf32>
    %cst_19 = arith.constant dense<0.000000e+00> : vector<32x128xf32>
    %24 = tpu.matmul %21, %23, %cst_19 {dimension_numbers = #tpu.dot_dimension_numbers<[1], [0], [0], [1], [0, 0, 1, 1], [], []>} : vector<32x128xf32>, vector<128x128xf32>, vector<32x128xf32> -> vector<32x128xf32>
    %25 = arith.addf %20, %24 : vector<32x128xf32>
    %26 = vector.extract_strided_slice %14 {offsets = [64, 0], sizes = [32, 128], strides = [1, 1]} : vector<256x128xf32> to vector<32x128xf32>
    %c2 = arith.constant 2 : index
    %c0_20 = arith.constant 0 : index
    %c0_21 = arith.constant 0 : index
    %27 = vector.load %arg6[%c2, %c0_20, %c0_21] : memref<8x128x128xf32, #tpu.memory_space<vmem>>, vector<1x128x128xf32>
    %28 = vector.shape_cast %27 : vector<1x128x128xf32> to vector<128x128xf32>
    %cst_22 = arith.constant dense<0.000000e+00> : vector<32x128xf32>
    %29 = tpu.matmul %26, %28, %cst_22 {dimension_numbers = #tpu.dot_dimension_numbers<[1], [0], [0], [1], [0, 0, 1, 1], [], []>} : vector<32x128xf32>, vector<128x128xf32>, vector<32x128xf32> -> vector<32x128xf32>
    %30 = arith.addf %25, %29 : vector<32x128xf32>
    %31 = vector.extract_strided_slice %14 {offsets = [96, 0], sizes = [32, 128], strides = [1, 1]} : vector<256x128xf32> to vector<32x128xf32>
    %c3 = arith.constant 3 : index
    %c0_23 = arith.constant 0 : index
    %c0_24 = arith.constant 0 : index
    %32 = vector.load %arg6[%c3, %c0_23, %c0_24] : memref<8x128x128xf32, #tpu.memory_space<vmem>>, vector<1x128x128xf32>
    %33 = vector.shape_cast %32 : vector<1x128x128xf32> to vector<128x128xf32>
    %cst_25 = arith.constant dense<0.000000e+00> : vector<32x128xf32>
    %34 = tpu.matmul %31, %33, %cst_25 {dimension_numbers = #tpu.dot_dimension_numbers<[1], [0], [0], [1], [0, 0, 1, 1], [], []>} : vector<32x128xf32>, vector<128x128xf32>, vector<32x128xf32> -> vector<32x128xf32>
    %35 = arith.addf %30, %34 : vector<32x128xf32>
    %36 = vector.extract_strided_slice %14 {offsets = [128, 0], sizes = [32, 128], strides = [1, 1]} : vector<256x128xf32> to vector<32x128xf32>
    %c4 = arith.constant 4 : index
    %c0_26 = arith.constant 0 : index
    %c0_27 = arith.constant 0 : index
    %37 = vector.load %arg6[%c4, %c0_26, %c0_27] : memref<8x128x128xf32, #tpu.memory_space<vmem>>, vector<1x128x128xf32>
    %38 = vector.shape_cast %37 : vector<1x128x128xf32> to vector<128x128xf32>
    %cst_28 = arith.constant dense<0.000000e+00> : vector<32x128xf32>
    %39 = tpu.matmul %36, %38, %cst_28 {dimension_numbers = #tpu.dot_dimension_numbers<[1], [0], [0], [1], [0, 0, 1, 1], [], []>} : vector<32x128xf32>, vector<128x128xf32>, vector<32x128xf32> -> vector<32x128xf32>
    %40 = arith.addf %35, %39 : vector<32x128xf32>
    %41 = vector.extract_strided_slice %14 {offsets = [160, 0], sizes = [32, 128], strides = [1, 1]} : vector<256x128xf32> to vector<32x128xf32>
    %c5 = arith.constant 5 : index
    %c0_29 = arith.constant 0 : index
    %c0_30 = arith.constant 0 : index
    %42 = vector.load %arg6[%c5, %c0_29, %c0_30] : memref<8x128x128xf32, #tpu.memory_space<vmem>>, vector<1x128x128xf32>
    %43 = vector.shape_cast %42 : vector<1x128x128xf32> to vector<128x128xf32>
    %cst_31 = arith.constant dense<0.000000e+00> : vector<32x128xf32>
    %44 = tpu.matmul %41, %43, %cst_31 {dimension_numbers = #tpu.dot_dimension_numbers<[1], [0], [0], [1], [0, 0, 1, 1], [], []>} : vector<32x128xf32>, vector<128x128xf32>, vector<32x128xf32> -> vector<32x128xf32>
    %45 = arith.addf %40, %44 : vector<32x128xf32>
    %46 = vector.extract_strided_slice %14 {offsets = [192, 0], sizes = [32, 128], strides = [1, 1]} : vector<256x128xf32> to vector<32x128xf32>
    %c6 = arith.constant 6 : index
    %c0_32 = arith.constant 0 : index
    %c0_33 = arith.constant 0 : index
    %47 = vector.load %arg6[%c6, %c0_32, %c0_33] : memref<8x128x128xf32, #tpu.memory_space<vmem>>, vector<1x128x128xf32>
    %48 = vector.shape_cast %47 : vector<1x128x128xf32> to vector<128x128xf32>
    %cst_34 = arith.constant dense<0.000000e+00> : vector<32x128xf32>
    %49 = tpu.matmul %46, %48, %cst_34 {dimension_numbers = #tpu.dot_dimension_numbers<[1], [0], [0], [1], [0, 0, 1, 1], [], []>} : vector<32x128xf32>, vector<128x128xf32>, vector<32x128xf32> -> vector<32x128xf32>
    %50 = arith.addf %45, %49 : vector<32x128xf32>
    %51 = vector.extract_strided_slice %14 {offsets = [224, 0], sizes = [32, 128], strides = [1, 1]} : vector<256x128xf32> to vector<32x128xf32>
    %c7 = arith.constant 7 : index
    %c0_35 = arith.constant 0 : index
    %c0_36 = arith.constant 0 : index
    %52 = vector.load %arg6[%c7, %c0_35, %c0_36] : memref<8x128x128xf32, #tpu.memory_space<vmem>>, vector<1x128x128xf32>
    %53 = vector.shape_cast %52 : vector<1x128x128xf32> to vector<128x128xf32>
    %cst_37 = arith.constant dense<0.000000e+00> : vector<32x128xf32>
    %54 = tpu.matmul %51, %53, %cst_37 {dimension_numbers = #tpu.dot_dimension_numbers<[1], [0], [0], [1], [0, 0, 1, 1], [], []>} : vector<32x128xf32>, vector<128x128xf32>, vector<32x128xf32> -> vector<32x128xf32>
    %55 = arith.addf %50, %54 : vector<32x128xf32>
    %c0_38 = arith.constant 0 : index
    %c0_39 = arith.constant 0 : index
    %56 = vector.load %arg7[%c0_38, %c0_39] : memref<1x128xf32, #tpu.memory_space<vmem>>, vector<1x128xf32>
    %57 = vector.broadcast %56 : vector<1x128xf32> to vector<32x128xf32>
    %58 = arith.addf %55, %57 : vector<32x128xf32>
    %cst_40 = arith.constant dense<0xFF800000> : vector<32xf32>
    %59 = vector.multi_reduction <maximumf>, %58, %cst_40 [1] : vector<32x128xf32> to vector<32xf32>
    %60 = vector.shape_cast %59 : vector<32xf32> to vector<32x1xf32>
    %61 = vector.broadcast %60 : vector<32x1xf32> to vector<32x128xf32>
    %62 = arith.subf %58, %61 : vector<32x128xf32>
    %63 = math.exp %62 : vector<32x128xf32>
    %cst_41 = arith.constant dense<0.000000e+00> : vector<32xf32>
    %64 = vector.multi_reduction <add>, %63, %cst_41 [1] : vector<32x128xf32> to vector<32xf32>
    %65 = vector.shape_cast %64 : vector<32xf32> to vector<32x1xf32>
    %66 = vector.broadcast %65 : vector<32x1xf32> to vector<32x128xf32>
    %67 = arith.divf %63, %66 : vector<32x128xf32>
    %c0_42 = arith.constant 0 : index
    %c0_43 = arith.constant 0 : index
    %68 = vector.load %arg8[%c0_42, %c0_43] : memref<32x128xf32, #tpu.memory_space<vmem>>, vector<32x128xf32>
    tpu.vector_store %arg8[%c0_42, %c0_43], %67 {strides = array<i32>} : memref<32x128xf32, #tpu.memory_space<vmem>>, vector<32x128xf32>,
    return
  }
  func.func @transform_0(%arg0: i32) -> (i32, i32) {
    %c0_i32 = arith.constant 0 : i32
    %c0_i32_0 = arith.constant 0 : i32
    return %arg0, %c0_i32 : i32, i32
  }
  func.func @transform_1(%arg0: i32) -> (i32, i32) {
    %c0_i32 = arith.constant 0 : i32
    %c0_i32_0 = arith.constant 0 : i32
    %c0_i32_1 = arith.constant 0 : i32
    return %c0_i32, %c0_i32_0 : i32, i32
  }
  func.func @transform_2(%arg0: i32) -> (i32, i32) {
    %c0_i32 = arith.constant 0 : i32
    %c0_i32_0 = arith.constant 0 : i32
    %c0_i32_1 = arith.constant 0 : i32
    return %c0_i32, %c0_i32_0 : i32, i32
  }
  func.func @transform_3(%arg0: i32) -> (i32, i32) {
    %c0_i32 = arith.constant 0 : i32
    %c0_i32_0 = arith.constant 0 : i32
    %c0_i32_1 = arith.constant 0 : i32
    return %c0_i32, %c0_i32_0 : i32, i32
  }
  func.func @transform_4(%arg0: i32) -> (i32, i32) {
    %c0_i32 = arith.constant 0 : i32
    %c0_i32_0 = arith.constant 0 : i32
    %c0_i32_1 = arith.constant 0 : i32
    return %c0_i32, %c0_i32_0 : i32, i32
  }
  func.func @transform_5(%arg0: i32) -> (i32, i32, i32) {
    %c0_i32 = arith.constant 0 : i32
    %c0_i32_0 = arith.constant 0 : i32
    %c0_i32_1 = arith.constant 0 : i32
    %c0_i32_2 = arith.constant 0 : i32
    return %c0_i32, %c0_i32_0, %c0_i32_1 : i32, i32, i32
  }
  func.func @transform_6(%arg0: i32) -> (i32, i32) {
    %c0_i32 = arith.constant 0 : i32
    %c0_i32_0 = arith.constant 0 : i32
    %c0_i32_1 = arith.constant 0 : i32
    return %c0_i32, %c0_i32_0 : i32, i32
  }
  func.func @transform_7(%arg0: i32) -> (i32, i32) {
    %c0_i32 = arith.constant 0 : i32
    %c0_i32_0 = arith.constant 0 : i32
    return %arg0, %c0_i32 : i32, i32
  }
}

</mosaic_0001>

<bundles_post_ra>
// kernel: eiie_forward.1
= control target key start
LH: loop header
LB: loop body
LE: loop exit
PB: predicated region body
PF: predicated region fallthrough
CT: control target
= control target key end

     0   :  { %12 = vsyncpa [#allocation3], 0  ;;  %s2641_s24 = smov [#allocation2]   ;;  %s3037_s0 = inlined_call_operand.vmem [shape: f32[256,128], index: 0, kind: input, shape index: {}]   ;;  %s3038_s1 = inlined_call_operand.vmem [shape: f32[128,128], index: 1, kind: input, shape index: {}]   ;;  %s3039_s2 = inlined_call_operand.vmem [shape: f32[1,128], index: 2, kind: input, shape index: {}]   ;;  %s3040_s3 = inlined_call_operand.vmem [shape: f32[128,128], index: 3, kind: input, shape index: {}]   ;;  %s3041_s4 = inlined_call_operand.vmem [shape: f32[1,128], index: 4, kind: input, shape index: {}]   ;;  %s3042_s5 = inlined_call_operand.hbm [shape: f32[8,128,128], index: 5, kind: input, shape index: {}]   ;;  %s3043_s6 = inlined_call_operand.vmem [shape: f32[1,128], index: 6, kind: input, shape index: {}]   ;;  %s3044_s7 = inlined_call_operand.vmem [shape: f32[32,128], index: 7, kind: output, shape index: {}]  }
   0x1   :  { %s28_s25 = sshll.u32 %s2641_s24, 4  ;;  %s2617_s28 = scalar_lea.hbm %s3042_s5, 16384  ;;  %s29_s25 = int_to_ptr.vmem [resolvable:$true] %s28_s25 }
   0x2   :  { %p2618_p0 = scmp.ne.s32.totalorder %s3042_s5, %s2617_s28  ;;  %p2621_p1 = scmp.lt.u32.totalorder %s2617_s28, %s3042_s5 }
   0x4   :  { %p2623_p2 = pnand %p2621_p1, %p2618_p0 }
   0x6   :  { %2626 = shalt.err (!%p2623_p2)
}
   0x7   :  { %s2627_s10 = scalar_lea.vmem %s29_s25, 16384  ;;  %p2632_p4 = scmp.lt.s32.totalorder %s29_s25, %s29_s25 }
   0x8   :  { %p2628_p3 = scmp.ne.s32.totalorder %s29_s25, %s2627_s10  ;;  %p2633_p5 = scmp.lt.s32.totalorder %s2627_s10, %s2627_s10 }
   0xa   :  { %p2634_p6 = por %p2633_p5, %p2632_p4 }
   0xc   :  { %p2635_p7 = pnand %p2634_p6, %p2628_p3 }
   0xe   :  { %2638 = shalt.err (!%p2635_p7)
}
   0xf   :  { %s2642_s11 = smov 128   ;;  %s2643_s12 = smov 8  }
  0x10   :  { %34 = dma.hbm_to_vmem [thread:$0]  %s3042_s5, 16384, %s29_s25, [#allocation3], %s2642_s11, %s2642_s11, %s2643_s12  }
  0x11   :  { %2639 = dma.done.wait [#allocation3], 16384  }
  0x12   :  { %2640 = vsyncadd [#allocation3], 4294950912  ;;  %v72_v0 = vld [vmem:[%s3038_s1] sm:$0xff]  ;;  %v73_v1 = vld [vmem:[%s3038_s1 + $0x8] sm:$0xff] }
  0x13   :  { %v74_v2 = vld [vmem:[%s3038_s1 + $0x10] sm:$0xff]  ;;  %v2250_v3 = vpack.c.bf16 %v73_v1, %v72_v0  ;;  %v75_v4 = vld [vmem:[%s3038_s1 + $0x18] sm:$0xff]  ;;  %v76_v6 = vld [vmem:[%s3038_s1 + $0x20] sm:$0xff] }
  0x14   :  { %v2254_v5 = vpack.c.bf16 %v75_v4, %v74_v2  ;;  %v77_v7 = vld [vmem:[%s3038_s1 + $0x28] sm:$0xff]  ;;  %v40_v9 = vld [vmem:[%s3037_s0] sm:$0xff]  ;;  %v78_v10 = vld [vmem:[%s3038_s1 + $0x30] sm:$0xff] }
  0x15   :  { %2251 = vmatprep.subr.bf16.mxu1 %v2250_v3  ;;  %v2258_v8 = vpack.c.bf16 %v77_v7, %v76_v6  ;;  %v79_v11 = vld [vmem:[%s3038_s1 + $0x38] sm:$0xff]  ;;  %1818 = vmatprep.mubr.f32.mxu1 %v40_v9  ;;  %v80_v13 = vld [vmem:[%s3038_s1 + $0x40] sm:$0xff]  ;;  %v81_v14 = vld [vmem:[%s3038_s1 + $0x48] sm:$0xff] }
  0x16   :  { %2253 = vmatpush3.bf16.msra.mxu1 %v2250_v3  ;;  %v2262_v12 = vpack.c.bf16 %v79_v11, %v78_v10  ;;  %v2266_v15 = vpack.c.bf16 %v81_v14, %v80_v13  ;;  %v82_v16 = vld [vmem:[%s3038_s1 + $0x50] sm:$0xff]  ;;  %v83_v17 = vld [vmem:[%s3038_s1 + $0x58] sm:$0xff]  ;;  %v84_v19 = vld [vmem:[%s3038_s1 + $0x60] sm:$0xff] }
  0x17   :  { %2255 = vmatprep.subr.bf16.mxu1 %v2254_v5  ;;  %v2270_v18 = vpack.c.bf16 %v83_v17, %v82_v16  ;;  %v85_v20 = vld [vmem:[%s3038_s1 + $0x68] sm:$0xff]  ;;  %v86_v22 = vld [vmem:[%s3038_s1 + $0x70] sm:$0xff]  ;;  %v87_v23 = vld [vmem:[%s3038_s1 + $0x78] sm:$0xff] }
  0x18   :  { %v2274_v21 = vpack.c.bf16 %v85_v20, %v84_v19  ;;  %v2278_v24 = vpack.c.bf16 %v87_v23, %v86_v22  ;;  %v352_v25 = vld [vmem:[%s3040_s3] sm:$0xff]  ;;  %v353_v26 = vld [vmem:[%s3040_s3 + $0x8] sm:$0xff]  ;;  %v354_v28 = vld [vmem:[%s3040_s3 + $0x10] sm:$0xff] }
  0x19   :  { %v2282_v27 = vpack.c.bf16 %v353_v26, %v352_v25  ;;  %v355_v29 = vld [vmem:[%s3040_s3 + $0x18] sm:$0xff]  ;;  %v41_v30 = vld [vmem:[%s3037_s0 + $0x8] sm:$0xff]  ;;  %v42_v31 = vld [vmem:[%s3037_s0 + $0x10] sm:$0xff] }
  0x1a   :  { %2257 = vmatpush3.bf16.msra.mxu1 %v2254_v5  ;;  %v2286_v32 = vpack.c.bf16 %v355_v29, %v354_v28  ;;  %v356_v33 = vld [vmem:[%s3040_s3 + $0x20] sm:$0xff]  ;;  %v357_v34 = vld [vmem:[%s3040_s3 + $0x28] sm:$0xff]  ;;  %v43_v35 = vld [vmem:[%s3037_s0 + $0x18] sm:$0xff] }
  0x1b   :  { %2259 = vmatprep.subr.bf16.mxu1 %v2258_v8  ;;  %v44_v36 = vld [vmem:[%s3037_s0 + $0x20] sm:$0xff]  ;;  %v2290_v37 = vpack.c.bf16 %v357_v34, %v356_v33  ;;  %v358_v38 = vld [vmem:[%s3040_s3 + $0x30] sm:$0xff]  ;;  %v359_v39 = vld [vmem:[%s3040_s3 + $0x38] sm:$0xff] }
  0x1c   :  { %v45_v40 = vld [vmem:[%s3037_s0 + $0x28] sm:$0xff]  ;;  %v46_v41 = vld [vmem:[%s3037_s0 + $0x30] sm:$0xff]  ;;  %v2294_v42 = vpack.c.bf16 %v359_v39, %v358_v38  ;;  %v360_v43 = vld [vmem:[%s3040_s3 + $0x40] sm:$0xff] }
  0x1d   :  { %v361_v44 = vld [vmem:[%s3040_s3 + $0x48] sm:$0xff]  ;;  %v47_v45 = vld [vmem:[%s3037_s0 + $0x38] sm:$0xff]  ;;  %v48_v46 = vld [vmem:[%s3037_s0 + $0x40] sm:$0xff] }
  0x1e   :  { %2261 = vmatpush3.bf16.msra.mxu1 %v2258_v8  ;;  %v2298_v47 = vpack.c.bf16 %v361_v44, %v360_v43  ;;  %v362_v48 = vld [vmem:[%s3040_s3 + $0x50] sm:$0xff]  ;;  %v363_v49 = vld [vmem:[%s3040_s3 + $0x58] sm:$0xff]  ;;  %v49_v50 = vld [vmem:[%s3037_s0 + $0x48] sm:$0xff] }
  0x1f   :  { %2263 = vmatprep.subr.bf16.mxu1 %v2262_v12  ;;  %v50_v51 = vld [vmem:[%s3037_s0 + $0x50] sm:$0xff]  ;;  %v2302_v52 = vpack.c.bf16 %v363_v49, %v362_v48  ;;  %v364_v53 = vld [vmem:[%s3040_s3 + $0x60] sm:$0xff]  ;;  %v365_v54 = vld [vmem:[%s3040_s3 + $0x68] sm:$0xff] }
  0x20   :  { %v51_v55 = vld [vmem:[%s3037_s0 + $0x58] sm:$0xff]  ;;  %v52_v56 = vld [vmem:[%s3037_s0 + $0x60] sm:$0xff]  ;;  %v2306_v57 = vpack.c.bf16 %v365_v54, %v364_v53  ;;  %v366_v58 = vld [vmem:[%s3040_s3 + $0x70] sm:$0xff] }
  0x21   :  { %v367_v59 = vld [vmem:[%s3040_s3 + $0x78] sm:$0xff]  ;;  %v53_v60 = vld [vmem:[%s3037_s0 + $0x68] sm:$0xff]  ;;  %v54_v61 = vld [vmem:[%s3037_s0 + $0x70] sm:$0xff] }
  0x22   :  { %2265 = vmatpush3.bf16.msra.mxu1 %v2262_v12  ;;  %v2310_v62 = vpack.c.bf16 %v367_v59, %v366_v58  ;;  %v55_v63 = vld [vmem:[%s3037_s0 + $0x78] sm:$0xff]  ;;  %v56_v0 = vld [vmem:[%s3037_s0 + $0x80] sm:$0xff]  ;;  %v57_v1 = vld [vmem:[%s3037_s0 + $0x88] sm:$0xff] }
  0x23   :  { %2267 = vmatprep.subr.bf16.mxu1 %v2266_v15  ;;  %v58_v2 = vld [vmem:[%s3037_s0 + $0x90] sm:$0xff]  ;;  %v59_v3 = vld [vmem:[%s3037_s0 + $0x98] sm:$0xff]  ;;  %v60_v4 = vld [vmem:[%s3037_s0 + $0xa0] sm:$0xff] }
  0x24   :  { %v61_v5 = vld [vmem:[%s3037_s0 + $0xa8] sm:$0xff]  ;;  %v62_v6 = vld [vmem:[%s3037_s0 + $0xb0] sm:$0xff]  ;;  %v63_v7 = vld [vmem:[%s3037_s0 + $0xb8] sm:$0xff] }
  0x25   :  { %v64_v8 = vld [vmem:[%s3037_s0 + $0xc0] sm:$0xff]  ;;  %v65_v9 = vld [vmem:[%s3037_s0 + $0xc8] sm:$0xff]  ;;  %v66_v10 = vld [vmem:[%s3037_s0 + $0xd0] sm:$0xff] }
  0x26   :  { %2269 = vmatpush3.bf16.msra.mxu1 %v2266_v15  ;;  %v67_v11 = vld [vmem:[%s3037_s0 + $0xd8] sm:$0xff]  ;;  %v68_v12 = vld [vmem:[%s3037_s0 + $0xe0] sm:$0xff]  ;;  %v69_v13 = vld [vmem:[%s3037_s0 + $0xe8] sm:$0xff] }
  0x27   :  { %2271 = vmatprep.subr.bf16.mxu1 %v2270_v18  ;;  %v70_v14 = vld [vmem:[%s3037_s0 + $0xf0] sm:$0xff]  ;;  %v71_v15 = vld [vmem:[%s3037_s0 + $0xf8] sm:$0xff]  ;;  %v649_v16 = vld [vmem:[#allocation2 + $0x80] sm:$0xff] }
  0x28   :  { %v650_v17 = vld [vmem:[#allocation2 + $0x88] sm:$0xff]  ;;  %v836_v19 = vld [vmem:[#allocation2 + $0x100] sm:$0xff]  ;;  %v838_v22 = vld [vmem:[#allocation2 + $0x110] sm:$0xff] }
  0x29   :  { %v837_v20 = vld [vmem:[#allocation2 + $0x108] sm:$0xff]  ;;  %v839_v23 = vld [vmem:[#allocation2 + $0x118] sm:$0xff]  ;;  %v840_v25 = vld [vmem:[#allocation2 + $0x120] sm:$0xff] }
  0x2a   :  { %2273 = vmatpush3.bf16.msra.mxu1 %v2270_v18  ;;  %v2314_v18 = vpack.c.bf16 %v650_v17, %v649_v16  ;;  %v841_v26 = vld [vmem:[#allocation2 + $0x128] sm:$0xff]  ;;  %v2891_v28 = vld [vmem:[%s3039_s2] ss:$0 sm:$0xff]  ;;  %v651_v33 = vld [vmem:[#allocation2 + $0x90] sm:$0xff] }
  0x2b   :  { %2275 = vmatprep.subr.bf16.mxu1 %v2274_v21  ;;  %v652_v34 = vld [vmem:[#allocation2 + $0x98] sm:$0xff]  ;;  %v654_v43 = vld [vmem:[#allocation2 + $0xa8] sm:$0xff] }
  0x2e   :  { %2277 = vmatpush3.bf16.msra.mxu1 %v2274_v21  ;;  %v2378_v21 = vpack.c.bf16 %v837_v20, %v836_v19 }
  0x2f   :  { %2279 = vmatprep.subr.bf16.mxu1 %v2278_v24 }
  0x30   :  { %2379 = vmatprep.subr.bf16.mxu0 %v2378_v21 }
  0x31   :  { %2381 = vmatpush3.bf16.msra.mxu0 %v2378_v21 }
  0x32   :  { %2281 = vmatpush3.bf16.msra.mxu1 %v2278_v24  ;;  %v2382_v24 = vpack.c.bf16 %v839_v23, %v838_v22 }
  0x33   :  { %2283 = vmatprep.subr.bf16.mxu1 %v2282_v27 }
  0x34   :  { %2383 = vmatprep.subr.bf16.mxu0 %v2382_v24 }
  0x35   :  { %1819 = vmatmul.mubr.f32.vlgmr.msra.gmra.mrb[0].mxu1 %v41_v30  ;;  %2385 = vmatpush3.bf16.msra.mxu0 %v2382_v24 }
  0x36   :  { %1821 = vmatprep.mubr.f32.mxu1 %v42_v31  ;;  %2285 = vmatpush3.bf16.msra.mxu1 %v2282_v27  ;;  %v2386_v27 = vpack.c.bf16 %v841_v26, %v840_v25 }
  0x37   :  { %2287 = vmatprep.subr.bf16.mxu1 %v2286_v32 }
  0x38   :  { %2387 = vmatprep.subr.bf16.mxu0 %v2386_v27 }
  0x39   :  { %1822 = vmatmul.mubr.f32.gmra.mrb[2].mxu1 %v43_v35  ;;  %2389 = vmatpush3.bf16.msra.mxu0 %v2386_v27 }
  0x3a   :  { %1824 = vmatprep.mubr.f32.mxu1 %v44_v36  ;;  %2289 = vmatpush3.bf16.msra.mxu1 %v2286_v32 }
  0x3b   :  { %2291 = vmatprep.subr.bf16.mxu1 %v2290_v37 }
  0x3d   :  { %1825 = vmatmul.mubr.f32.gmra.mrb[4].mxu1 %v45_v40  ;;  %v2318_v40 = vpack.c.bf16 %v652_v34, %v651_v33 }
  0x3e   :  { %1827 = vmatprep.mubr.f32.mxu1 %v46_v41  ;;  %2293 = vmatpush3.bf16.msra.mxu1 %v2290_v37 }
  0x3f   :  { %2295 = vmatprep.subr.bf16.mxu1 %v2294_v42 }
  0x41   :  { %1828 = vmatmul.mubr.f32.gmra.mrb[6].mxu1 %v47_v45 }
  0x42   :  { %1830 = vmatprep.mubr.f32.mxu1 %v48_v46  ;;  %2297 = vmatpush3.bf16.msra.mxu1 %v2294_v42  ;;  %v653_v42 = vld [vmem:[#allocation2 + $0xa0] sm:$0xff] }
  0x43   :  { %2299 = vmatprep.subr.bf16.mxu1 %v2298_v47  ;;  %v2322_v49 = vpack.c.bf16 %v654_v43, %v653_v42 }
  0x45   :  { %1831 = vmatmul.mubr.f32.gmra.mrb[8].mxu1 %v49_v50 }
  0x46   :  { %1833 = vmatprep.mubr.f32.mxu1 %v50_v51  ;;  %2301 = vmatpush3.bf16.msra.mxu1 %v2298_v47  ;;  %v655_v51 = vld [vmem:[#allocation2 + $0xb0] sm:$0xff] }
  0x47   :  { %2303 = vmatprep.subr.bf16.mxu1 %v2302_v52 }
  0x49   :  { %1834 = vmatmul.mubr.f32.gmra.mrb[10].mxu1 %v51_v55 }
  0x4a   :  { %1836 = vmatprep.mubr.f32.mxu1 %v52_v56  ;;  %2305 = vmatpush3.bf16.msra.mxu1 %v2302_v52  ;;  %v656_v52 = vld [vmem:[#allocation2 + $0xb8] sm:$0xff] }
  0x4b   :  { %2307 = vmatprep.subr.bf16.mxu1 %v2306_v57  ;;  %v2326_v58 = vpack.c.bf16 %v656_v52, %v655_v51 }
  0x4d   :  { %1837 = vmatmul.mubr.f32.gmra.mrb[12].mxu1 %v53_v60  ;;  %v657_v60 = vld [vmem:[#allocation2 + $0xc0] sm:$0xff] }
  0x4e   :  { %1839 = vmatprep.mubr.f32.mxu1 %v54_v61  ;;  %2309 = vmatpush3.bf16.msra.mxu1 %v2306_v57  ;;  %v658_v61 = vld [vmem:[#allocation2 + $0xc8] sm:$0xff] }
  0x4f   :  { %2311 = vmatprep.subr.bf16.mxu1 %v2310_v62 }
  0x51   :  { %1840 = vmatmul.mubr.f32.gmra.mrb[14].mxu1 %v55_v63 }
  0x52   :  { %1842 = vmatprep.mubr.f32.mxu1 %v56_v0  ;;  %2313 = vmatpush3.bf16.msra.mxu1 %v2310_v62 }
  0x53   :  { %2315 = vmatprep.subr.bf16.mxu1 %v2314_v18 }
  0x55   :  { %1843 = vmatmul.mubr.f32.gmra.mrb[16].mxu1 %v57_v1 }
  0x56   :  { %1845 = vmatprep.mubr.f32.mxu1 %v58_v2 }
  0x59   :  { %1846 = vmatmul.mubr.f32.gmra.mrb[18].mxu1 %v59_v3  ;;  %v2330_v3 = vpack.c.bf16 %v658_v61, %v657_v60 }
  0x5a   :  { %1848 = vmatprep.mubr.f32.mxu1 %v60_v4 }
  0x5d   :  { %1849 = vmatmul.mubr.f32.gmra.mrb[20].mxu1 %v61_v5 }
  0x5e   :  { %1851 = vmatprep.mubr.f32.mxu1 %v62_v6 }
  0x61   :  { %1852 = vmatmul.mubr.f32.gmra.mrb[22].mxu1 %v63_v7 }
  0x62   :  { %1854 = vmatprep.mubr.f32.mxu1 %v64_v8 }
  0x65   :  { %1855 = vmatmul.mubr.f32.gmra.mrb[24].mxu1 %v65_v9 }
  0x66   :  { %1857 = vmatprep.mubr.f32.mxu1 %v66_v10 }
  0x69   :  { %1858 = vmatmul.mubr.f32.gmra.mrb[26].mxu1 %v67_v11 }
  0x6a   :  { %1860 = vmatprep.mubr.f32.mxu1 %v68_v12 }
  0x6d   :  { %1861 = vmatmul.mubr.f32.gmra.mrb[28].mxu1 %v69_v13 }
  0x6e   :  { %1863 = vmatprep.mubr.f32.mxu1 %v70_v14 }
  0x71   :  { %1864 = vmatmul.mubr.f32.gmra.mrb[30].mxu1 %v71_v15 }
 0x108   :  { %v1820_v29 = vpop.f32.mrb[0].mxu1 }
 0x109   :  { %v167_v30 = vadd.f32 %v1820_v29, %v2891_v28  ;;  %v161_v31 = vpop.f32.mrb[1].mxu1 }
 0x10a   :  { %v162_v32 = vadd.f32 %v2891_v28, %v161_v31 }
 0x10b   :  { %v321_v37 = vmax.f32 %v167_v30, 0.0 }
 0x10c   :  { %v320_v35 = vmax.f32 %v162_v32, 0.0  ;;  %v1823_v36 = vpop.f32.mrb[2].mxu1 }
 0x10d   :  { %v177_v38 = vadd.f32 %v1823_v36, %v2891_v28  ;;  %v171_v39 = vpop.f32.mrb[3].mxu1 }
 0x10e   :  { %v172_v41 = vadd.f32 %v2891_v28, %v171_v39  ;;  %1898 = vmatprep.mubr.f32.mxu1 %v320_v35 }
 0x10f   :  { %1899 = vmatmul.mubr.f32.vlgmr.msra.gmra.mrb[32].mxu1 %v321_v37  ;;  %v323_v46 = vmax.f32 %v177_v38, 0.0 }
 0x110   :  { %v322_v44 = vmax.f32 %v172_v41, 0.0  ;;  %v1826_v45 = vpop.f32.mrb[4].mxu1  ;;  %2317 = vmatpush3.bf16.msra.mxu1 %v2314_v18 }
 0x111   :  { %v187_v47 = vadd.f32 %v1826_v45, %v2891_v28  ;;  %v181_v48 = vpop.f32.mrb[5].mxu1  ;;  %2319 = vmatprep.subr.bf16.mxu1 %v2318_v40 }
 0x112   :  { %v182_v50 = vadd.f32 %v2891_v28, %v181_v48  ;;  %1901 = vmatprep.mubr.f32.mxu1 %v322_v44 }
 0x113   :  { %1902 = vmatmul.mubr.f32.gmra.mrb[34].mxu1 %v323_v46  ;;  %v325_v55 = vmax.f32 %v187_v47, 0.0 }
 0x114   :  { %v324_v53 = vmax.f32 %v182_v50, 0.0  ;;  %v1829_v54 = vpop.f32.mrb[6].mxu1  ;;  %2321 = vmatpush3.bf16.msra.mxu1 %v2318_v40 }
 0x115   :  { %v197_v56 = vadd.f32 %v1829_v54, %v2891_v28  ;;  %v191_v57 = vpop.f32.mrb[7].mxu1  ;;  %2323 = vmatprep.subr.bf16.mxu1 %v2322_v49 }
 0x116   :  { %v192_v59 = vadd.f32 %v2891_v28, %v191_v57  ;;  %1904 = vmatprep.mubr.f32.mxu1 %v324_v53 }
 0x117   :  { %1905 = vmatmul.mubr.f32.gmra.mrb[36].mxu1 %v325_v55  ;;  %v327_v0 = vmax.f32 %v197_v56, 0.0 }
 0x118   :  { %v326_v62 = vmax.f32 %v192_v59, 0.0  ;;  %v1832_v63 = vpop.f32.mrb[8].mxu1  ;;  %2325 = vmatpush3.bf16.msra.mxu1 %v2322_v49 }
 0x119   :  { %v207_v1 = vadd.f32 %v1832_v63, %v2891_v28  ;;  %v201_v2 = vpop.f32.mrb[9].mxu1  ;;  %2327 = vmatprep.subr.bf16.mxu1 %v2326_v58 }
 0x11a   :  { %v202_v4 = vadd.f32 %v2891_v28, %v201_v2  ;;  %1907 = vmatprep.mubr.f32.mxu1 %v326_v62 }
 0x11b   :  { %1908 = vmatmul.mubr.f32.gmra.mrb[38].mxu1 %v327_v0  ;;  %v329_v7 = vmax.f32 %v207_v1, 0.0 }
 0x11c   :  { %v328_v5 = vmax.f32 %v202_v4, 0.0  ;;  %v1835_v6 = vpop.f32.mrb[10].mxu1  ;;  %2329 = vmatpush3.bf16.msra.mxu1 %v2326_v58 }
 0x11d   :  { %v217_v8 = vadd.f32 %v1835_v6, %v2891_v28  ;;  %v211_v9 = vpop.f32.mrb[11].mxu1  ;;  %2331 = vmatprep.subr.bf16.mxu1 %v2330_v3 }
 0x11e   :  { %1910 = vmatprep.mubr.f32.mxu1 %v328_v5  ;;  %v212_v10 = vadd.f32 %v2891_v28, %v211_v9 }
 0x11f   :  { %1911 = vmatmul.mubr.f32.gmra.mrb[40].mxu1 %v329_v7  ;;  %v331_v11 = vmax.f32 %v217_v8, 0.0 }
 0x120   :  { %v330_v12 = vmax.f32 %v212_v10, 0.0  ;;  %v1838_v13 = vpop.f32.mrb[12].mxu1  ;;  %2333 = vmatpush3.bf16.msra.mxu1 %v2330_v3  ;;  %v659_v10 = vld [vmem:[#allocation2 + $0xd0] sm:$0xff] }
 0x121   :  { %v227_v14 = vadd.f32 %v1838_v13, %v2891_v28  ;;  %v221_v15 = vpop.f32.mrb[13].mxu1 }
 0x122   :  { %v222_v16 = vadd.f32 %v2891_v28, %v221_v15  ;;  %1913 = vmatprep.mubr.f32.mxu1 %v330_v12  ;;  %v842_v12 = vld [vmem:[#allocation2 + $0x130] sm:$0xff] }
 0x123   :  { %v333_v17 = vmax.f32 %v227_v14, 0.0  ;;  %1914 = vmatmul.mubr.f32.gmra.mrb[42].mxu1 %v331_v11  ;;  %v660_v11 = vld [vmem:[#allocation2 + $0xd8] sm:$0xff] }
 0x124   :  { %v332_v18 = vmax.f32 %v222_v16, 0.0  ;;  %v1841_v19 = vpop.f32.mrb[14].mxu1  ;;  %v2334_v13 = vpack.c.bf16 %v660_v11, %v659_v10  ;;  %v843_v14 = vld [vmem:[#allocation2 + $0x138] sm:$0xff]  ;;  %v661_v16 = vld [vmem:[#allocation2 + $0xe0] sm:$0xff] }
 0x125   :  { %v237_v20 = vadd.f32 %v1841_v19, %v2891_v28  ;;  %v231_v21 = vpop.f32.mrb[15].mxu1  ;;  %v2390_v15 = vpack.c.bf16 %v843_v14, %v842_v12  ;;  %v845_v19 = vld [vmem:[#allocation2 + $0x148] sm:$0xff]  ;;  %v640_v14 = vld [vmem:[#allocation2 + $0x40] sm:$0xff] }
 0x126   :  { %1916 = vmatprep.mubr.f32.mxu1 %v332_v18  ;;  %v232_v22 = vadd.f32 %v2891_v28, %v231_v21  ;;  %2335 = vmatprep.subr.bf16.mxu1 %v2334_v13  ;;  %v844_v18 = vld [vmem:[#allocation2 + $0x140] sm:$0xff]  ;;  %v663_v21 = vld [vmem:[#allocation2 + $0xf0] sm:$0xff] }
 0x127   :  { %1917 = vmatmul.mubr.f32.gmra.mrb[44].mxu1 %v333_v17  ;;  %v335_v23 = vmax.f32 %v237_v20, 0.0  ;;  %2391 = vmatprep.subr.bf16.mxu0 %v2390_v15  ;;  %v662_v17 = vld [vmem:[#allocation2 + $0xe8] sm:$0xff]  ;;  %v2394_v20 = vpack.c.bf16 %v845_v19, %v844_v18  ;;  %v946_v18 = vld [vmem:[#allocation2 + $0x1a0] sm:$0xff] }
 0x128   :  { %v334_v24 = vmax.f32 %v232_v22, 0.0  ;;  %v1844_v25 = vpop.f32.mrb[16].mxu1  ;;  %2337 = vmatpush3.bf16.msra.mxu1 %v2334_v13  ;;  %2393 = vmatpush3.bf16.msra.mxu0 %v2390_v15  ;;  %v664_v22 = vld [vmem:[#allocation2 + $0xf8] sm:$0xff] }
 0x129   :  { %v247_v26 = vadd.f32 %v1844_v25, %v2891_v28  ;;  %v241_v27 = vpop.f32.mrb[17].mxu1  ;;  %2395 = vmatprep.subr.bf16.mxu0 %v2394_v20  ;;  %v847_v25 = vld [vmem:[#allocation2 + $0x158] sm:$0xff] }
 0x12a   :  { %v242_v29 = vadd.f32 %v2891_v28, %v241_v27  ;;  %1919 = vmatprep.mubr.f32.mxu1 %v334_v24  ;;  %v2342_v24 = vpack.c.bf16 %v664_v22, %v663_v21  ;;  %v632_v27 = vld [vmem:[#allocation2] sm:$0xff] }
 0x12b   :  { %v337_v30 = vmax.f32 %v247_v26, 0.0  ;;  %1920 = vmatmul.mubr.f32.gmra.mrb[46].mxu1 %v335_v23  ;;  %v846_v23 = vld [vmem:[#allocation2 + $0x150] sm:$0xff] }
 0x12c   :  { %v336_v31 = vmax.f32 %v242_v29, 0.0  ;;  %v1847_v32 = vpop.f32.mrb[18].mxu1  ;;  %2397 = vmatpush3.bf16.msra.mxu0 %v2394_v20  ;;  %v2398_v26 = vpack.c.bf16 %v847_v25, %v846_v23  ;;  %v633_v29 = vld [vmem:[#allocation2 + $0x8] sm:$0xff]  ;;  %v642_v25 = vld [vmem:[#allocation2 + $0x50] sm:$0xff] }
 0x12d   :  { %v257_v33 = vadd.f32 %v1847_v32, %v2891_v28  ;;  %v251_v34 = vpop.f32.mrb[19].mxu1  ;;  %v849_v32 = vld [vmem:[#allocation2 + $0x168] sm:$0xff] }
 0x12e   :  { %1922 = vmatprep.mubr.f32.mxu1 %v336_v31  ;;  %v252_v35 = vadd.f32 %v2891_v28, %v251_v34  ;;  %2399 = vmatprep.subr.bf16.mxu0 %v2398_v26  ;;  %v2346_v31 = vpack.c.bf16 %v633_v29, %v632_v27  ;;  %v850_v34 = vld [vmem:[#allocation2 + $0x170] sm:$0xff]  ;;  %v643_v27 = vld [vmem:[#allocation2 + $0x58] sm:$0xff] }
 0x12f   :  { %1923 = vmatmul.mubr.f32.gmra.mrb[48].mxu1 %v337_v30  ;;  %v339_v36 = vmax.f32 %v257_v33, 0.0  ;;  %v848_v30 = vld [vmem:[#allocation2 + $0x160] sm:$0xff]  ;;  %v948_v29 = vld [vmem:[#allocation2 + $0x1b0] sm:$0xff] }
 0x130   :  { %v338_v37 = vmax.f32 %v252_v35, 0.0  ;;  %v1850_v38 = vpop.f32.mrb[20].mxu1  ;;  %2401 = vmatpush3.bf16.msra.mxu0 %v2398_v26  ;;  %v2402_v33 = vpack.c.bf16 %v849_v32, %v848_v30  ;;  %v851_v35 = vld [vmem:[#allocation2 + $0x178] sm:$0xff] }
 0x131   :  { %v267_v39 = vadd.f32 %v1850_v38, %v2891_v28  ;;  %v261_v40 = vpop.f32.mrb[21].mxu1  ;;  %v943_v38 = vld [vmem:[#allocation2 + $0x188] sm:$0xff]  ;;  %v949_v30 = vld [vmem:[#allocation2 + $0x1b8] sm:$0xff] }
 0x132   :  { %v262_v41 = vadd.f32 %v2891_v28, %v261_v40  ;;  %1925 = vmatprep.mubr.f32.mxu1 %v338_v37  ;;  %2403 = vmatprep.subr.bf16.mxu0 %v2402_v33  ;;  %v942_v37 = vld [vmem:[#allocation2 + $0x180] sm:$0xff] }
 0x133   :  { %v341_v42 = vmax.f32 %v267_v39, 0.0  ;;  %1926 = vmatmul.mubr.f32.gmra.mrb[50].mxu1 %v339_v36  ;;  %v2406_v36 = vpack.c.bf16 %v851_v35, %v850_v34  ;;  %v2410_v39 = vpack.c.bf16 %v943_v38, %v942_v37  ;;  %v2366_v34 = vpack.c.bf16 %v643_v27, %v642_v25  ;;  %v645_v38 = vld [vmem:[#allocation2 + $0x68] sm:$0xff] }
 0x134   :  { %v340_v43 = vmax.f32 %v262_v41, 0.0  ;;  %v1853_v44 = vpop.f32.mrb[22].mxu1  ;;  %2405 = vmatpush3.bf16.msra.mxu0 %v2402_v33  ;;  %v2422_v35 = vpack.c.bf16 %v949_v30, %v948_v29 }
 0x135   :  { %v277_v45 = vadd.f32 %v1853_v44, %v2891_v28  ;;  %v271_v46 = vpop.f32.mrb[23].mxu1  ;;  %2407 = vmatprep.subr.bf16.mxu0 %v2406_v36  ;;  %v2934_v44 = vld [vmem:[%s3041_s4] ss:$0 sm:$0xff] }
 0x136   :  { %1928 = vmatprep.mubr.f32.mxu1 %v340_v43  ;;  %v272_v47 = vadd.f32 %v2891_v28, %v271_v46 }
 0x137   :  { %1929 = vmatmul.mubr.f32.gmra.mrb[52].mxu1 %v341_v42  ;;  %v343_v48 = vmax.f32 %v277_v45, 0.0 }
 0x138   :  { %v342_v49 = vmax.f32 %v272_v47, 0.0  ;;  %v1856_v50 = vpop.f32.mrb[24].mxu1  ;;  %2409 = vmatpush3.bf16.msra.mxu0 %v2406_v36  ;;  %v644_v36 = vld [vmem:[#allocation2 + $0x60] sm:$0xff] }
 0x139   :  { %v287_v51 = vadd.f32 %v1856_v50, %v2891_v28  ;;  %v281_v52 = vpop.f32.mrb[25].mxu1  ;;  %2411 = vmatprep.subr.bf16.mxu0 %v2410_v39  ;;  %v635_v50 = vld [vmem:[#allocation2 + $0x18] sm:$0xff] }
 0x13a   :  { %v282_v53 = vadd.f32 %v2891_v28, %v281_v52  ;;  %1931 = vmatprep.mubr.f32.mxu1 %v342_v49  ;;  %v634_v49 = vld [vmem:[#allocation2 + $0x10] sm:$0xff] }
 0x13b   :  { %v345_v54 = vmax.f32 %v287_v51, 0.0  ;;  %1932 = vmatmul.mubr.f32.gmra.mrb[54].mxu1 %v343_v48 }
 0x13c   :  { %v344_v55 = vmax.f32 %v282_v53, 0.0  ;;  %v1859_v56 = vpop.f32.mrb[26].mxu1 }
 0x13d   :  { %v297_v57 = vadd.f32 %v1859_v56, %v2891_v28  ;;  %v291_v58 = vpop.f32.mrb[27].mxu1  ;;  %v2350_v56 = vpack.c.bf16 %v635_v50, %v634_v49 }
 0x13e   :  { %1934 = vmatprep.mubr.f32.mxu1 %v344_v55  ;;  %v292_v59 = vadd.f32 %v2891_v28, %v291_v58 }
 0x13f   :  { %1935 = vmatmul.mubr.f32.gmra.mrb[56].mxu1 %v345_v54  ;;  %v347_v60 = vmax.f32 %v297_v57, 0.0 }
 0x140   :  { %v346_v61 = vmax.f32 %v292_v59, 0.0  ;;  %v1862_v62 = vpop.f32.mrb[28].mxu1  ;;  %v636_v59 = vld [vmem:[#allocation2 + $0x20] sm:$0xff] }
 0x141   :  { %v307_v63 = vadd.f32 %v1862_v62, %v2891_v28  ;;  %v301_v0 = vpop.f32.mrb[29].mxu1 }
 0x142   :  { %v302_v1 = vadd.f32 %v2891_v28, %v301_v0  ;;  %1937 = vmatprep.mubr.f32.mxu1 %v346_v61 }
 0x143   :  { %v349_v2 = vmax.f32 %v307_v63, 0.0  ;;  %1938 = vmatmul.mubr.f32.gmra.mrb[58].mxu1 %v347_v60  ;;  %v637_v60 = vld [vmem:[#allocation2 + $0x28] sm:$0xff] }
 0x144   :  { %v348_v3 = vmax.f32 %v302_v1, 0.0  ;;  %v1865_v4 = vpop.f32.mrb[30].mxu1 }
 0x145   :  { %v317_v5 = vadd.f32 %v1865_v4, %v2891_v28  ;;  %v311_v6 = vpop.f32.mrb[31].mxu1 }
 0x146   :  { %v312_v7 = vadd.f32 %v2891_v28, %v311_v6  ;;  %1940 = vmatprep.mubr.f32.mxu1 %v348_v3  ;;  %v2338_v28 = vpack.c.bf16 %v662_v17, %v661_v16  ;;  %v638_v3 = vld [vmem:[#allocation2 + $0x30] sm:$0xff]  ;;  %v639_v6 = vld [vmem:[#allocation2 + $0x38] sm:$0xff]  ;;  %v641_v17 = vld [vmem:[#allocation2 + $0x48] sm:$0xff] }
 0x147   :  { %v351_v8 = vmax.f32 %v317_v5, 0.0  ;;  %1941 = vmatmul.mubr.f32.gmra.mrb[60].mxu1 %v349_v2  ;;  %v2354_v2 = vpack.c.bf16 %v637_v60, %v636_v59  ;;  %v2358_v12 = vpack.c.bf16 %v639_v6, %v638_v3  ;;  %v2362_v23 = vpack.c.bf16 %v641_v17, %v640_v14  ;;  %v954_v59 = vld [vmem:[#allocation2 + $0x1e0] sm:$0xff]  ;;  %v955_v60 = vld [vmem:[#allocation2 + $0x1e8] sm:$0xff] }
 0x148   :  { %v350_v9 = vmax.f32 %v312_v7, 0.0  ;;  %2339 = vmatprep.subr.bf16.mxu1 %v2338_v28  ;;  %v944_v7 = vld [vmem:[#allocation2 + $0x190] sm:$0xff] }
 0x149   :  { %2341 = vmatpush3.bf16.msra.mxu1 %v2338_v28  ;;  %v947_v28 = vld [vmem:[#allocation2 + $0x1a8] sm:$0xff] }
 0x14a   :  { %1943 = vmatprep.mubr.f32.mxu1 %v350_v9  ;;  %2343 = vmatprep.subr.bf16.mxu1 %v2342_v24 }
 0x14b   :  { %1944 = vmatmul.mubr.f32.gmra.mrb[62].mxu1 %v351_v8  ;;  %v945_v8 = vld [vmem:[#allocation2 + $0x198] sm:$0xff] }
 0x14c   :  { %v2414_v13 = vpack.c.bf16 %v945_v8, %v944_v7 }
 0x14d   :  { %2345 = vmatpush3.bf16.msra.mxu1 %v2342_v24  ;;  %v2418_v24 = vpack.c.bf16 %v947_v28, %v946_v18 }
 0x14e   :  { %2347 = vmatprep.subr.bf16.mxu1 %v2346_v31 }
 0x1e2   :  { %v2925_v40 = vpop.f32.mrb[32].mxu1 }
 0x1e3   :  { %v441_v41 = vpop.f32.mrb[33].mxu1 }
 0x1e4   :  { %v442_v57 = vadd.f32 %v2934_v44, %v441_v41  ;;  %v951_v41 = vld [vmem:[#allocation2 + $0x1c8] sm:$0xff] }
 0x1e6   :  { %v2927_v42 = vpop.f32.mrb[34].mxu1  ;;  %v600_v4 = vmax.f32 %v442_v57, 0.0 }
 0x1e7   :  { %v2929_v43 = vpop.f32.mrb[35].mxu1 }
 0x1e8   :  { %v452_v3 = vadd.f32 %v2934_v44, %v2929_v43  ;;  %v1048_v43 = vld [vmem:[#allocation2 + $0x200] sm:$0xff] }
 0x1ea   :  { %v1906_v45 = vpop.f32.mrb[36].mxu1 }
 0x1eb   :  { %v467_v46 = vadd.f32 %v1906_v45, %v2934_v44  ;;  %v461_v47 = vpop.f32.mrb[37].mxu1 }
 0x1ec   :  { %v462_v48 = vadd.f32 %v2934_v44, %v461_v47 }
 0x1ed   :  { %v605_v53 = vmax.f32 %v467_v46, 0.0  ;;  %v2370_v46 = vpack.c.bf16 %v645_v38, %v644_v36 }
 0x1ee   :  { %v604_v51 = vmax.f32 %v462_v48, 0.0  ;;  %v1909_v52 = vpop.f32.mrb[38].mxu1  ;;  %v646_v48 = vld [vmem:[#allocation2 + $0x70] sm:$0xff] }
 0x1ef   :  { %v477_v54 = vadd.f32 %v1909_v52, %v2934_v44  ;;  %v471_v55 = vpop.f32.mrb[39].mxu1  ;;  %v952_v52 = vld [vmem:[#allocation2 + $0x1d0] sm:$0xff] }
 0x1f0   :  { %v472_v58 = vadd.f32 %v2934_v44, %v471_v55  ;;  %1978 = vmatprep.mubr.f32.mxu1 %v604_v51  ;;  %v647_v51 = vld [vmem:[#allocation2 + $0x78] sm:$0xff] }
 0x1f1   :  { %1979 = vmatmul.mubr.f32.vlgmr.msra.gmra.mrb[64].mxu1 %v605_v53  ;;  %v607_v63 = vmax.f32 %v477_v54, 0.0  ;;  %v953_v53 = vld [vmem:[#allocation2 + $0x1d8] sm:$0xff]  ;;  %v2374_v55 = vpack.c.bf16 %v647_v51, %v646_v48 }
 0x1f2   :  { %v606_v61 = vmax.f32 %v472_v58, 0.0  ;;  %2349 = vmatpush3.bf16.msra.mxu1 %v2346_v31  ;;  %v1912_v62 = vpop.f32.mrb[40].mxu1 }
 0x1f3   :  { %v487_v0 = vadd.f32 %v1912_v62, %v2934_v44  ;;  %v481_v1 = vpop.f32.mrb[41].mxu1  ;;  %2351 = vmatprep.subr.bf16.mxu1 %v2350_v56 }
 0x1f4   :  { %1981 = vmatprep.mubr.f32.mxu1 %v606_v61  ;;  %v482_v5 = vadd.f32 %v2934_v44, %v481_v1 }
 0x1f5   :  { %1982 = vmatmul.mubr.f32.gmra.mrb[66].mxu1 %v607_v63  ;;  %v609_v11 = vmax.f32 %v487_v0, 0.0  ;;  %v447_v63 = vadd.f32 %v2925_v40, %v2934_v44  ;;  %v2434_v0 = vpack.c.bf16 %v955_v60, %v954_v59  ;;  %v457_v40 = vadd.f32 %v2927_v42, %v2934_v44  ;;  %v1059_v59 = vld [vmem:[#allocation2 + $0x258] sm:$0xff] }
 0x1f6   :  { %2353 = vmatpush3.bf16.msra.mxu1 %v2350_v56  ;;  %2016 = vmatprep.mubr.f32.mxu1 %v600_v4  ;;  %v608_v9 = vmax.f32 %v482_v5, 0.0  ;;  %v1915_v10 = vpop.f32.mrb[42].mxu1  ;;  %v2430_v56 = vpack.c.bf16 %v953_v53, %v952_v52  ;;  %v956_v4 = vld [vmem:[#allocation2 + $0x1f0] sm:$0xff]  ;;  %v957_v5 = vld [vmem:[#allocation2 + $0x1f8] sm:$0xff]  ;;  %v1056_v53 = vld [vmem:[#allocation2 + $0x240] sm:$0xff] }
 0x1f7   :  { %2355 = vmatprep.subr.bf16.mxu1 %v2354_v2  ;;  %v497_v15 = vadd.f32 %v1915_v10, %v2934_v44  ;;  %v491_v16 = vpop.f32.mrb[43].mxu1  ;;  %v601_v8 = vmax.f32 %v447_v63, 0.0  ;;  %v603_v17 = vmax.f32 %v457_v40, 0.0  ;;  %v1061_v63 = vld [vmem:[#allocation2 + $0x268] sm:$0xff]  ;;  %v1157_v40 = vld [vmem:[#allocation2 + $0x298] sm:$0xff] }
 0x1f8   :  { %2054 = vmatprep.mubr.f32.mxu0 %v608_v9  ;;  %v492_v19 = vadd.f32 %v2934_v44, %v491_v16  ;;  %v2438_v9 = vpack.c.bf16 %v957_v5, %v956_v4  ;;  %v1155_v5 = vld [vmem:[#allocation2 + $0x288] sm:$0xff] }
 0x1f9   :  { %2055 = vmatmul.mubr.f32.vlgmr.msra.gmra.mrb[0].mxu0 %v609_v11  ;;  %v611_v20 = vmax.f32 %v497_v15, 0.0 }
 0x1fa   :  { %2357 = vmatpush3.bf16.msra.mxu1 %v2354_v2  ;;  %2413 = vmatpush3.bf16.msra.mxu0 %v2410_v39  ;;  %v610_v21 = vmax.f32 %v492_v19, 0.0  ;;  %v2945_v22 = vpop.f32.mrb[44].mxu1  ;;  %v950_v39 = vld [vmem:[#allocation2 + $0x1c0] sm:$0xff] }
 0x1fb   :  { %2359 = vmatprep.subr.bf16.mxu1 %v2358_v12  ;;  %2415 = vmatprep.subr.bf16.mxu0 %v2414_v13  ;;  %v501_v26 = vpop.f32.mrb[45].mxu1  ;;  %v2426_v47 = vpack.c.bf16 %v951_v41, %v950_v39  ;;  %v507_v42 = vadd.f32 %v2945_v22, %v2934_v44 }
 0x1fc   :  { %v502_v31 = vadd.f32 %v2934_v44, %v501_v26  ;;  %2057 = vmatprep.mubr.f32.mxu0 %v610_v21  ;;  %v1051_v21 = vld [vmem:[#allocation2 + $0x218] sm:$0xff] }
 0x1fd   :  { %2058 = vmatmul.mubr.f32.gmra.mrb[2].mxu0 %v611_v20  ;;  %v1050_v20 = vld [vmem:[#allocation2 + $0x210] sm:$0xff]  ;;  %v613_v27 = vmax.f32 %v507_v42, 0.0 }
 0x1fe   :  { %2361 = vmatpush3.bf16.msra.mxu1 %v2358_v12  ;;  %2417 = vmatpush3.bf16.msra.mxu0 %v2414_v13  ;;  %v612_v32 = vmax.f32 %v502_v31, 0.0  ;;  %v2948_v33 = vpop.f32.mrb[46].mxu1  ;;  %v602_v12 = vmax.f32 %v452_v3, 0.0  ;;  %v1049_v13 = vld [vmem:[#allocation2 + $0x208] sm:$0xff]  ;;  %v2446_v29 = vpack.c.bf16 %v1051_v21, %v1050_v20  ;;  %v1063_v3 = vld [vmem:[#allocation2 + $0x278] sm:$0xff]  ;;  %v1160_v42 = vld [vmem:[#allocation2 + $0x2b0] sm:$0xff] }
 0x1ff   :  { %2363 = vmatprep.subr.bf16.mxu1 %v2362_v23  ;;  %2419 = vmatprep.subr.bf16.mxu0 %v2418_v24  ;;  %v511_v37 = vpop.f32.mrb[47].mxu1  ;;  %v2442_v18 = vpack.c.bf16 %v1049_v13, %v1048_v43  ;;  %v1158_v43 = vld [vmem:[#allocation2 + $0x2a0] sm:$0xff]  ;;  %v1159_v13 = vld [vmem:[#allocation2 + $0x2a8] sm:$0xff]  ;;  %v1164_v21 = vld [vmem:[#allocation2 + $0x2d0] sm:$0xff] }
 0x200   :  { %2092 = vmatprep.mubr.f32.mxu0 %v612_v32  ;;  %v512_v15 = vadd.f32 %v2934_v44, %v511_v37  ;;  %v1052_v32 = vld [vmem:[#allocation2 + $0x220] sm:$0xff] }
 0x202   :  { %2365 = vmatpush3.bf16.msra.mxu1 %v2362_v23  ;;  %2421 = vmatpush3.bf16.msra.mxu0 %v2418_v24  ;;  %v1924_v45 = vpop.f32.mrb[48].mxu1  ;;  %v517_v24 = vadd.f32 %v2948_v33, %v2934_v44  ;;  %v614_v25 = vmax.f32 %v512_v15, 0.0 }
 0x203   :  { %2367 = vmatprep.subr.bf16.mxu1 %v2366_v34  ;;  %2423 = vmatprep.subr.bf16.mxu0 %v2422_v35  ;;  %v2951_v49 = vadd.f32 %v1924_v45, %v2934_v44  ;;  %v521_v50 = vpop.f32.mrb[49].mxu1  ;;  %v1054_v45 = vld [vmem:[#allocation2 + $0x230] sm:$0xff] }
 0x204   :  { %v522_v26 = vadd.f32 %v2934_v44, %v521_v50  ;;  %v615_v36 = vmax.f32 %v517_v24, 0.0  ;;  %v1166_v24 = vld [vmem:[#allocation2 + $0x2e0] sm:$0xff] }
 0x206   :  { %2369 = vmatpush3.bf16.msra.mxu1 %v2366_v34  ;;  %2425 = vmatpush3.bf16.msra.mxu0 %v2422_v35  ;;  %v1927_v54 = vpop.f32.mrb[50].mxu1  ;;  %v1053_v34 = vld [vmem:[#allocation2 + $0x228] sm:$0xff]  ;;  %v616_v33 = vmax.f32 %v522_v26, 0.0 }
 0x207   :  { %2371 = vmatprep.subr.bf16.mxu1 %v2370_v46  ;;  %2427 = vmatprep.subr.bf16.mxu0 %v2426_v47  ;;  %v2954_v57 = vadd.f32 %v1927_v54, %v2934_v44  ;;  %v531_v58 = vpop.f32.mrb[51].mxu1  ;;  %v2450_v38 = vpack.c.bf16 %v1053_v34, %v1052_v32  ;;  %v1057_v54 = vld [vmem:[#allocation2 + $0x248] sm:$0xff] }
 0x208   :  { %v2957_v61 = vadd.f32 %v2934_v44, %v531_v58  ;;  %v1058_v58 = vld [vmem:[#allocation2 + $0x250] sm:$0xff]  ;;  %v1261_v32 = vld [vmem:[#allocation2 + $0x308] sm:$0xff] }
 0x209   :  { %v2462_v60 = vpack.c.bf16 %v1059_v59, %v1058_v58  ;;  %v619_v15 = vmax.f32 %v2954_v57, 0.0  ;;  %v1165_v57 = vld [vmem:[#allocation2 + $0x2d8] sm:$0xff]  ;;  %v1270_v59 = vld [vmem:[#allocation2 + $0x350] sm:$0xff] }
 0x20a   :  { %2373 = vmatpush3.bf16.msra.mxu1 %v2370_v46  ;;  %2429 = vmatpush3.bf16.msra.mxu0 %v2426_v47  ;;  %v1930_v62 = vpop.f32.mrb[52].mxu1  ;;  %v1055_v46 = vld [vmem:[#allocation2 + $0x238] sm:$0xff] }
 0x20b   :  { %2375 = vmatprep.subr.bf16.mxu1 %v2374_v55  ;;  %2431 = vmatprep.subr.bf16.mxu0 %v2430_v56  ;;  %v2962_v1 = vadd.f32 %v1930_v62, %v2934_v44  ;;  %v541_v2 = vpop.f32.mrb[53].mxu1  ;;  %v2454_v50 = vpack.c.bf16 %v1055_v46, %v1054_v45  ;;  %v1060_v62 = vld [vmem:[#allocation2 + $0x260] sm:$0xff]  ;;  %v1265_v46 = vld [vmem:[#allocation2 + $0x328] sm:$0xff] }
 0x20c   :  { %v2967_v6 = vadd.f32 %v2934_v44, %v541_v2  ;;  %v1062_v2 = vld [vmem:[#allocation2 + $0x270] sm:$0xff]  ;;  %v1264_v45 = vld [vmem:[#allocation2 + $0x320] sm:$0xff] }
 0x20d   :  { %v2470_v4 = vpack.c.bf16 %v1063_v3, %v1062_v2  ;;  %v1275_v2 = vld [vmem:[#allocation2 + $0x378] sm:$0xff] }
 0x20e   :  { %2377 = vmatpush3.bf16.msra.mxu1 %v2374_v55  ;;  %2433 = vmatpush3.bf16.msra.mxu0 %v2430_v56  ;;  %v1933_v7 = vpop.f32.mrb[54].mxu1  ;;  %v2458_v56 = vpack.c.bf16 %v1057_v54, %v1056_v53  ;;  %v1266_v53 = vld [vmem:[#allocation2 + $0x330] sm:$0xff]  ;;  %v1267_v54 = vld [vmem:[#allocation2 + $0x338] sm:$0xff] }
 0x20f   :  { %2435 = vmatprep.subr.bf16.mxu0 %v2434_v0  ;;  %v2972_v10 = vadd.f32 %v1933_v7, %v2934_v44  ;;  %v551_v11 = vpop.f32.mrb[55].mxu1 }
 0x210   :  { %v2975_v14 = vadd.f32 %v2934_v44, %v551_v11  ;;  %v617_v11 = vmax.f32 %v2951_v49, 0.0 }
 0x211   :  { %2017 = vmatmul.mubr.f32.vlgmr.msra.gmra.mrb[64].mxu1 %v601_v8  ;;  %v1156_v8 = vld [vmem:[#allocation2 + $0x290] sm:$0xff] }
 0x212   :  { %2019 = vmatprep.mubr.f32.mxu1 %v602_v12  ;;  %2437 = vmatpush3.bf16.msra.mxu0 %v2434_v0  ;;  %v1936_v16 = vpop.f32.mrb[56].mxu1  ;;  %v2466_v0 = vpack.c.bf16 %v1061_v63, %v1060_v62  ;;  %v2478_v12 = vpack.c.bf16 %v1157_v40, %v1156_v8  ;;  %v1273_v62 = vld [vmem:[#allocation2 + $0x368] sm:$0xff]  ;;  %v1369_v8 = vld [vmem:[#allocation2 + $0x398] sm:$0xff] }
 0x213   :  { %2439 = vmatprep.subr.bf16.mxu0 %v2438_v9  ;;  %v2981_v28 = vadd.f32 %v1936_v16, %v2934_v44  ;;  %v561_v19 = vpop.f32.mrb[57].mxu1  ;;  %v620_v16 = vmax.f32 %v2967_v6, 0.0  ;;  %v2494_v6 = vpack.c.bf16 %v1165_v57, %v1164_v21  ;;  %v1380_v57 = vld [vmem:[#allocation2 + $0x3f0] sm:$0xff] }
 0x214   :  { %v2984_v23 = vadd.f32 %v2934_v44, %v561_v19  ;;  %v1163_v19 = vld [vmem:[#allocation2 + $0x2c8] sm:$0xff] }
 0x215   :  { %2020 = vmatmul.mubr.f32.gmra.mrb[66].mxu1 %v603_v17  ;;  %v2482_v17 = vpack.c.bf16 %v1159_v13, %v1158_v43  ;;  %v1371_v43 = vld [vmem:[#allocation2 + $0x3a8] sm:$0xff] }
 0x216   :  { %2441 = vmatpush3.bf16.msra.mxu0 %v2438_v9  ;;  %v1939_v22 = vpop.f32.mrb[58].mxu1  ;;  %v618_v9 = vmax.f32 %v2957_v61, 0.0  ;;  %v1162_v61 = vld [vmem:[#allocation2 + $0x2c0] sm:$0xff] }
 0x217   :  { %2443 = vmatprep.subr.bf16.mxu0 %v2442_v18  ;;  %v2990_v30 = vadd.f32 %v1939_v22, %v2934_v44  ;;  %v571_v31 = vpop.f32.mrb[59].mxu1  ;;  %v2490_v20 = vpack.c.bf16 %v1163_v19, %v1162_v61  ;;  %v1168_v22 = vld [vmem:[#allocation2 + $0x2f0] sm:$0xff]  ;;  %v1378_v19 = vld [vmem:[#allocation2 + $0x3e0] sm:$0xff] }
 0x218   :  { %v2993_v35 = vadd.f32 %v2934_v44, %v571_v31  ;;  %v1260_v31 = vld [vmem:[#allocation2 + $0x300] sm:$0xff]  ;;  %v1376_v61 = vld [vmem:[#allocation2 + $0x3d0] sm:$0xff] }
 0x219   :  { %2093 = vmatmul.mubr.f32.vlgmr.msra.gmra.mrb[0].mxu0 %v613_v27  ;;  %v1169_v27 = vld [vmem:[#allocation2 + $0x2f8] sm:$0xff]  ;;  %v2506_v34 = vpack.c.bf16 %v1261_v32, %v1260_v31  ;;  %v627_v13 = vmax.f32 %v2990_v30, 0.0 }
 0x21a   :  { %2445 = vmatpush3.bf16.msra.mxu0 %v2442_v18  ;;  %2095 = vmatprep.mubr.f32.mxu0 %v614_v25  ;;  %v1942_v37 = vpop.f32.mrb[60].mxu1  ;;  %v1161_v18 = vld [vmem:[#allocation2 + $0x2b8] sm:$0xff]  ;;  %v1167_v25 = vld [vmem:[#allocation2 + $0x2e8] sm:$0xff]  ;;  %v626_v40 = vmax.f32 %v2993_v35, 0.0  ;;  %v1374_v35 = vld [vmem:[#allocation2 + $0x3c0] sm:$0xff] }
 0x21b   :  { %2447 = vmatprep.subr.bf16.mxu0 %v2446_v29  ;;  %v2996_v39 = vadd.f32 %v1942_v37, %v2934_v44  ;;  %v581_v41 = vpop.f32.mrb[61].mxu1  ;;  %v2486_v49 = vpack.c.bf16 %v1161_v18, %v1160_v42  ;;  %v2498_v26 = vpack.c.bf16 %v1167_v25, %v1166_v24  ;;  %v622_v37 = vmax.f32 %v2975_v14, 0.0  ;;  %v1268_v14 = vld [vmem:[#allocation2 + $0x340] sm:$0xff]  ;;  %v1373_v42 = vld [vmem:[#allocation2 + $0x3b8] sm:$0xff]  ;;  %v1375_v18 = vld [vmem:[#allocation2 + $0x3c8] sm:$0xff] }
 0x21c   :  { %v2999_v47 = vadd.f32 %v2934_v44, %v581_v41  ;;  %v1377_v30 = vld [vmem:[#allocation2 + $0x3d8] sm:$0xff] }
 0x21d   :  { %2096 = vmatmul.mubr.f32.gmra.mrb[2].mxu0 %v615_v36  ;;  %v1262_v36 = vld [vmem:[#allocation2 + $0x310] sm:$0xff] }
 0x21e   :  { %2449 = vmatpush3.bf16.msra.mxu0 %v2446_v29  ;;  %2130 = vmatprep.mubr.f32.mxu0 %v616_v33  ;;  %v1945_v48 = vpop.f32.mrb[62].mxu1  ;;  %v2502_v29 = vpack.c.bf16 %v1169_v27, %v1168_v22  ;;  %v1263_v33 = vld [vmem:[#allocation2 + $0x318] sm:$0xff] }
 0x21f   :  { %2451 = vmatprep.subr.bf16.mxu0 %v2450_v38  ;;  %v3002_v51 = vadd.f32 %v1945_v48, %v2934_v44  ;;  %v591_v52 = vpop.f32.mrb[63].mxu1  ;;  %v2510_v41 = vpack.c.bf16 %v1263_v33, %v1262_v36  ;;  %v623_v48 = vmax.f32 %v2972_v10, 0.0  ;;  %v1271_v10 = vld [vmem:[#allocation2 + $0x358] sm:$0xff] }
 0x220   :  { %v3005_v55 = vadd.f32 %v2934_v44, %v591_v52  ;;  %v1154_v44 = vld [vmem:[#allocation2 + $0x280] sm:$0xff]  ;;  %v2514_v52 = vpack.c.bf16 %v1265_v46, %v1264_v45 }
 0x221   :  { %v2474_v7 = vpack.c.bf16 %v1155_v5, %v1154_v44  ;;  %v1367_v44 = vld [vmem:[#allocation2 + $0x388] sm:$0xff]  ;;  %v631_v22 = vmax.f32 %v3002_v51, 0.0 }
 0x222   :  { %2453 = vmatpush3.bf16.msra.mxu0 %v2450_v38  ;;  %v621_v38 = vmax.f32 %v2962_v1, 0.0  ;;  %v2518_v1 = vpack.c.bf16 %v1267_v54, %v1266_v53  ;;  %v630_v25 = vmax.f32 %v3005_v55, 0.0 }
 0x223   :  { %2455 = vmatprep.subr.bf16.mxu0 %v2454_v50 }
 0x226   :  { %2457 = vmatpush3.bf16.msra.mxu0 %v2454_v50  ;;  %v624_v50 = vmax.f32 %v2984_v23, 0.0  ;;  %v2526_v23 = vpack.c.bf16 %v1271_v10, %v1270_v59 }
 0x227   :  { %2459 = vmatprep.subr.bf16.mxu0 %v2458_v56 }
 0x22a   :  { %2461 = vmatpush3.bf16.msra.mxu0 %v2458_v56  ;;  %v1269_v56 = vld [vmem:[#allocation2 + $0x348] sm:$0xff] }
 0x22b   :  { %2463 = vmatprep.subr.bf16.mxu0 %v2462_v60  ;;  %v2522_v58 = vpack.c.bf16 %v1269_v56, %v1268_v14 }
 0x22e   :  { %2465 = vmatpush3.bf16.msra.mxu0 %v2462_v60  ;;  %v1272_v60 = vld [vmem:[#allocation2 + $0x360] sm:$0xff] }
 0x22f   :  { %2467 = vmatprep.subr.bf16.mxu0 %v2466_v0  ;;  %v2530_v63 = vpack.c.bf16 %v1273_v62, %v1272_v60 }
 0x232   :  { %2469 = vmatpush3.bf16.msra.mxu0 %v2466_v0  ;;  %v1274_v0 = vld [vmem:[#allocation2 + $0x370] sm:$0xff] }
 0x233   :  { %2471 = vmatprep.subr.bf16.mxu0 %v2470_v4  ;;  %v2534_v3 = vpack.c.bf16 %v1275_v2, %v1274_v0 }
 0x236   :  { %2473 = vmatpush3.bf16.msra.mxu0 %v2470_v4  ;;  %v1366_v4 = vld [vmem:[#allocation2 + $0x380] sm:$0xff] }
 0x237   :  { %2475 = vmatprep.subr.bf16.mxu0 %v2474_v7  ;;  %v2538_v5 = vpack.c.bf16 %v1367_v44, %v1366_v4 }
 0x239   :  { %2131 = vmatmul.mubr.f32.vlgmr.msra.gmra.mrb[0].mxu0 %v617_v11 }
 0x23a   :  { %2477 = vmatpush3.bf16.msra.mxu0 %v2474_v7  ;;  %2133 = vmatprep.mubr.f32.mxu0 %v618_v9  ;;  %v1368_v7 = vld [vmem:[#allocation2 + $0x390] sm:$0xff]  ;;  %v625_v9 = vmax.f32 %v2981_v28, 0.0 }
 0x23b   :  { %2479 = vmatprep.subr.bf16.mxu0 %v2478_v12  ;;  %v2542_v11 = vpack.c.bf16 %v1369_v8, %v1368_v7 }
 0x23d   :  { %2134 = vmatmul.mubr.f32.gmra.mrb[2].mxu0 %v619_v15  ;;  %v628_v15 = vmax.f32 %v2999_v47, 0.0  ;;  %v2558_v47 = vpack.c.bf16 %v1377_v30, %v1376_v61 }
 0x23e   :  { %2481 = vmatpush3.bf16.msra.mxu0 %v2478_v12  ;;  %2168 = vmatprep.mubr.f32.mxu0 %v620_v16  ;;  %v1370_v12 = vld [vmem:[#allocation2 + $0x3a0] sm:$0xff] }
 0x23f   :  { %2483 = vmatprep.subr.bf16.mxu0 %v2482_v17  ;;  %v2546_v16 = vpack.c.bf16 %v1371_v43, %v1370_v12 }
 0x242   :  { %2485 = vmatpush3.bf16.msra.mxu0 %v2482_v17  ;;  %v1372_v17 = vld [vmem:[#allocation2 + $0x3b0] sm:$0xff] }
 0x243   :  { %2487 = vmatprep.subr.bf16.mxu0 %v2486_v49  ;;  %v2550_v28 = vpack.c.bf16 %v1373_v42, %v1372_v17 }
 0x246   :  { %2489 = vmatpush3.bf16.msra.mxu0 %v2486_v49  ;;  %v2554_v49 = vpack.c.bf16 %v1375_v18, %v1374_v35 }
 0x247   :  { %2491 = vmatprep.subr.bf16.mxu0 %v2490_v20 }
 0x24a   :  { %2493 = vmatpush3.bf16.msra.mxu0 %v2490_v20  ;;  %v1379_v20 = vld [vmem:[#allocation2 + $0x3e8] sm:$0xff] }
 0x24b   :  { %2495 = vmatprep.subr.bf16.mxu0 %v2494_v6  ;;  %v2562_v21 = vpack.c.bf16 %v1379_v20, %v1378_v19 }
 0x24e   :  { %2497 = vmatpush3.bf16.msra.mxu0 %v2494_v6  ;;  %v1381_v6 = vld [vmem:[#allocation2 + $0x3f8] sm:$0xff] }
 0x24f   :  { %2499 = vmatprep.subr.bf16.mxu0 %v2498_v26  ;;  %v2566_v24 = vpack.c.bf16 %v1381_v6, %v1380_v57 }
 0x252   :  { %2501 = vmatpush3.bf16.msra.mxu0 %v2498_v26  ;;  %v629_v26 = vmax.f32 %v2996_v39, 0.0 }
 0x253   :  { %2503 = vmatprep.subr.bf16.mxu0 %v2502_v29 }
 0x256   :  { %2505 = vmatpush3.bf16.msra.mxu0 %v2502_v29 }
 0x257   :  { %2507 = vmatprep.subr.bf16.mxu0 %v2506_v34 }
 0x259   :  { %2169 = vmatmul.mubr.f32.vlgmr.msra.gmra.mrb[0].mxu0 %v621_v38 }
 0x25a   :  { %2509 = vmatpush3.bf16.msra.mxu0 %v2506_v34  ;;  %2171 = vmatprep.mubr.f32.mxu0 %v622_v37  ;;  %v1529_v37 = vld [vmem:[%s3043_s6] ss:$0 sm:$0xff] }
 0x25b   :  { %2511 = vmatprep.subr.bf16.mxu0 %v2510_v41 }
 0x25d   :  { %2172 = vmatmul.mubr.f32.gmra.mrb[2].mxu0 %v623_v48 }
 0x25e   :  { %2513 = vmatpush3.bf16.msra.mxu0 %v2510_v41  ;;  %2206 = vmatprep.mubr.f32.mxu0 %v624_v50 }
 0x25f   :  { %2515 = vmatprep.subr.bf16.mxu0 %v2514_v52 }
 0x262   :  { %2517 = vmatpush3.bf16.msra.mxu0 %v2514_v52 }
 0x263   :  { %2519 = vmatprep.subr.bf16.mxu0 %v2518_v1 }
 0x266   :  { %2521 = vmatpush3.bf16.msra.mxu0 %v2518_v1 }
 0x267   :  { %2523 = vmatprep.subr.bf16.mxu0 %v2522_v58 }
 0x26a   :  { %2525 = vmatpush3.bf16.msra.mxu0 %v2522_v58 }
 0x26b   :  { %2527 = vmatprep.subr.bf16.mxu0 %v2526_v23 }
 0x26e   :  { %2529 = vmatpush3.bf16.msra.mxu0 %v2526_v23 }
 0x26f   :  { %2531 = vmatprep.subr.bf16.mxu0 %v2530_v63 }
 0x272   :  { %2533 = vmatpush3.bf16.msra.mxu0 %v2530_v63 }
 0x273   :  { %2535 = vmatprep.subr.bf16.mxu0 %v2534_v3 }
 0x276   :  { %2537 = vmatpush3.bf16.msra.mxu0 %v2534_v3 }
 0x277   :  { %2539 = vmatprep.subr.bf16.mxu0 %v2538_v5 }
 0x279   :  { %2207 = vmatmul.mubr.f32.vlgmr.msra.gmra.mrb[0].mxu0 %v625_v9 }
 0x27a   :  { %2541 = vmatpush3.bf16.msra.mxu0 %v2538_v5  ;;  %2209 = vmatprep.mubr.f32.mxu0 %v626_v40 }
 0x27b   :  { %2543 = vmatprep.subr.bf16.mxu0 %v2542_v11 }
 0x27d   :  { %2210 = vmatmul.mubr.f32.gmra.mrb[2].mxu0 %v627_v13 }
 0x27e   :  { %2545 = vmatpush3.bf16.msra.mxu0 %v2542_v11  ;;  %2244 = vmatprep.mubr.f32.mxu0 %v628_v15 }
 0x27f   :  { %2547 = vmatprep.subr.bf16.mxu0 %v2546_v16 }
 0x282   :  { %2549 = vmatpush3.bf16.msra.mxu0 %v2546_v16 }
 0x283   :  { %2551 = vmatprep.subr.bf16.mxu0 %v2550_v28 }
 0x286   :  { %2553 = vmatpush3.bf16.msra.mxu0 %v2550_v28 }
 0x287   :  { %2555 = vmatprep.subr.bf16.mxu0 %v2554_v49 }
 0x28a   :  { %2557 = vmatpush3.bf16.msra.mxu0 %v2554_v49 }
 0x28b   :  { %2559 = vmatprep.subr.bf16.mxu0 %v2558_v47 }
 0x28e   :  { %2561 = vmatpush3.bf16.msra.mxu0 %v2558_v47 }
 0x28f   :  { %2563 = vmatprep.subr.bf16.mxu0 %v2562_v21 }
 0x292   :  { %2565 = vmatpush3.bf16.msra.mxu0 %v2562_v21 }
 0x293   :  { %2567 = vmatprep.subr.bf16.mxu0 %v2566_v24 }
 0x296   :  { %2569 = vmatpush3.bf16.msra.mxu0 %v2566_v24 }
 0x299   :  { %2245 = vmatmul.mubr.f32.vlgmr.msra.gmra.mrb[0].mxu0 %v629_v26 }
 0x29a   :  { %2247 = vmatprep.mubr.f32.mxu0 %v630_v25 }
 0x29d   :  { %2248 = vmatmul.mubr.f32.gmra.mrb[2].mxu0 %v631_v22 }
 0x2e4   :  { %v2018_v27 = vpop.f32.mrb[64].mxu1 }
 0x2e5   :  { %v816_v29 = vpop.f32.mrb[65].mxu1 }
 0x2e8   :  { %v2021_v31 = vpop.f32.mrb[66].mxu1 }
 0x2e9   :  { %v826_v32 = vpop.f32.mrb[67].mxu1 }
 0x36c   :  { %v2246_v34 = vpop.f32.mrb[0].mxu0 }
 0x36d   :  { %v2570_v36 = vadd.f32 %v2246_v34, %v2018_v27  ;;  %v1448_v33 = vpop.f32.mrb[1].mxu0 }
 0x36e   :  { %v2571_v55 = vadd.f32 %v1448_v33, %v816_v29 }
 0x36f   :  { %v1479_v51 = vadd.f32 %v2570_v36, %v1529_v37 }
 0x370   :  { %v2249_v38 = vpop.f32.mrb[2].mxu0  ;;  %v1478_v41 = vadd.f32 %v2571_v55, %v1529_v37 }
 0x371   :  { %v2572_v39 = vadd.f32 %v2249_v38, %v2021_v31  ;;  %v1458_v45 = vpop.f32.mrb[3].mxu0 }
 0x372   :  { %v2573_v46 = vadd.f32 %v1458_v45, %v826_v32  ;;  %1482 = vmax.xlane.f32.xlu0 %v1478_v41 }
 0x373   :  { %v1481_v50 = vadd.f32 %v2572_v39, %v1529_v37 }
 0x374   :  { %v1480_v48 = vadd.f32 %v2573_v46, %v1529_v37 }
 0x376   :  { %1484 = vmax.xlane.f32.xlu0 %v1479_v51  ;;  %1486 = vmax.xlane.f32.xlu1 %v1480_v48 }
 0x37a   :  { %1488 = vmax.xlane.f32.xlu1 %v1481_v50 }
 0x3ff   :  { %v1483_v52 = vpop.xlane.xlu0 %1482 }
 0x400   :  { %v1490_v53 = vsub.f32 %v1478_v41, %v1483_v52 }
 0x402   :  { %v1494_v54 = vmul.f32 1.442695, %v1490_v53 }
 0x403   :  { %v1485_v1 = vpop.xlane.xlu0 %1484  ;;  %v1487_v14 = vpop.xlane.xlu1 %1486 }
 0x404   :  { %2601 = vpow2.f32 %v1494_v54  ;;  %v1491_v56 = vsub.f32 %v1479_v51, %v1485_v1  ;;  %v1492_v58 = vsub.f32 %v1480_v48, %v1487_v14 }
 0x406   :  { %v1496_v59 = vmul.f32 1.442695, %v1491_v56  ;;  %v1498_v10 = vmul.f32 1.442695, %v1492_v58 }
 0x407   :  { %v1489_v23 = vpop.xlane.xlu1 %1488 }
 0x408   :  { %2603 = vpow2.f32 %v1496_v59  ;;  %v1493_v60 = vsub.f32 %v1481_v50, %v1489_v23 }
 0x409   :  { %2605 = vpow2.f32 %v1498_v10 }
 0x40a   :  { %v1500_v62 = vmul.f32 1.442695, %v1493_v60 }
 0x40c   :  { %2607 = vpow2.f32 %v1500_v62 }
 0x40e   :  { %v2602_v63 = vpop.eup %2601 }
 0x40f   :  { %1502 = vadd.xlane.f32.xlu0 %v2602_v63 }
 0x412   :  { %v2604_v0 = vpop.eup %2603 }
 0x413   :  { %v2606_v2 = vpop.eup %2605  ;;  %1504 = vadd.xlane.f32.xlu1 %v2604_v0 }
 0x414   :  { %1506 = vadd.xlane.f32.xlu0 %v2606_v2 }
 0x416   :  { %v2608_v3 = vpop.eup %2607 }
 0x417   :  { %1508 = vadd.xlane.f32.xlu1 %v2608_v3 }
 0x49c   :  { %v1503_v4 = vpop.xlane.xlu0 %1502 }
 0x49d   :  { %2609 = vrcp.f32 %v1503_v4 }
 0x4a0   :  { %v1505_v44 = vpop.xlane.xlu1 %1504 }
 0x4a1   :  { %v1507_v5 = vpop.xlane.xlu0 %1506  ;;  %2611 = vrcp.f32 %v1505_v44 }
 0x4a2   :  { %2613 = vrcp.f32 %v1507_v5 }
 0x4a4   :  { %v1509_v7 = vpop.xlane.xlu1 %1508 }
 0x4a5   :  { %2615 = vrcp.f32 %v1509_v7 }
 0x4a7   :  { %v2610_v8 = vpop.eup %2609 }
 0x4a8   :  { %v1511_v40 = vmul.f32 %v2610_v8, %v2602_v63 }
 0x4aa   :  { %1518 = vst [vmem:[%s3044_s7] sm:$0xff] %v1511_v40 }
 0x4ab   :  { %v2612_v9 = vpop.eup %2611 }
 0x4ac   :  { %v2614_v11 = vpop.eup %2613  ;;  %v1513_v12 = vmul.f32 %v2612_v9, %v2604_v0 }
 0x4ad   :  { %v1515_v43 = vmul.f32 %v2614_v11, %v2606_v2 }
 0x4ae   :  { %1519 = vst [vmem:[%s3044_s7 + $0x8] sm:$0xff] %v1513_v12 }
 0x4af   :  { %v2616_v13 = vpop.eup %2615  ;;  %1520 = vst [vmem:[%s3044_s7 + $0x10] sm:$0xff] %v1515_v43 }
 0x4b0   :  { %v1517_v15 = vmul.f32 %v2616_v13, %v2608_v3 }
 0x4b2   :  { %1521 = vst [vmem:[%s3044_s7 + $0x18] sm:$0xff] %v1517_v15 }
 0x4b3   :  { %1526 = vsyncpa [#allocation3], 1 }

// kernel: eiie_forward.1
= control target key start
LH: loop header
LB: loop body
LE: loop exit
PB: predicated region body
PF: predicated region fallthrough
CT: control target
= control target key end

     0   :  { %12 = vsyncpa [#allocation3], 0  ;;  %s2641_s24 = smov [#allocation2]   ;;  %s3037_s0 = inlined_call_operand.vmem [shape: f32[256,128], index: 0, kind: input, shape index: {}]   ;;  %s3038_s1 = inlined_call_operand.vmem [shape: f32[128,128], index: 1, kind: input, shape index: {}]   ;;  %s3039_s2 = inlined_call_operand.vmem [shape: f32[1,128], index: 2, kind: input, shape index: {}]   ;;  %s3040_s3 = inlined_call_operand.vmem [shape: f32[128,128], index: 3, kind: input, shape index: {}]   ;;  %s3041_s4 = inlined_call_operand.vmem [shape: f32[1,128], index: 4, kind: input, shape index: {}]   ;;  %s3042_s5 = inlined_call_operand.hbm [shape: f32[8,128,128], index: 5, kind: input, shape index: {}]   ;;  %s3043_s6 = inlined_call_operand.vmem [shape: f32[1,128], index: 6, kind: input, shape index: {}]   ;;  %s3044_s7 = inlined_call_operand.vmem [shape: f32[32,128], index: 7, kind: output, shape index: {}]  }
   0x1   :  { %s28_s25 = sshll.u32 %s2641_s24, 4  ;;  %s2617_s28 = scalar_lea.hbm %s3042_s5, 16384  ;;  %s29_s25 = int_to_ptr.vmem [resolvable:$true] %s28_s25 }
   0x2   :  { %p2618_p0 = scmp.ne.s32.totalorder %s3042_s5, %s2617_s28  ;;  %p2621_p1 = scmp.lt.u32.totalorder %s2617_s28, %s3042_s5 }
   0x4   :  { %p2623_p2 = pnand %p2621_p1, %p2618_p0 }
   0x6   :  { %2626 = shalt.err (!%p2623_p2)
}
   0x7   :  { %s2627_s10 = scalar_lea.vmem %s29_s25, 16384  ;;  %p2632_p4 = scmp.lt.s32.totalorder %s29_s25, %s29_s25 }
   0x8   :  { %p2628_p3 = scmp.ne.s32.totalorder %s29_s25, %s2627_s10  ;;  %p2633_p5 = scmp.lt.s32.totalorder %s2627_s10, %s2627_s10 }
   0xa   :  { %p2634_p6 = por %p2633_p5, %p2632_p4 }
   0xc   :  { %p2635_p7 = pnand %p2634_p6, %p2628_p3 }
   0xe   :  { %2638 = shalt.err (!%p2635_p7)
}
   0xf   :  { %s2642_s11 = smov 128   ;;  %s2643_s12 = smov 8  }
  0x10   :  { %34 = dma.hbm_to_vmem [thread:$0]  %s3042_s5, 16384, %s29_s25, [#allocation3], %s2642_s11, %s2642_s11, %s2643_s12  }
  0x11   :  { %2639 = dma.done.wait [#allocation3], 16384  }
  0x12   :  { %2640 = vsyncadd [#allocation3], 4294950912  ;;  %v72_v0 = vld [vmem:[%s3038_s1] sm:$0xff]  ;;  %v73_v1 = vld [vmem:[%s3038_s1 + $0x8] sm:$0xff] }
  0x13   :  { %v74_v2 = vld [vmem:[%s3038_s1 + $0x10] sm:$0xff]  ;;  %v2250_v3 = vpack.c.bf16 %v73_v1, %v72_v0  ;;  %v75_v4 = vld [vmem:[%s3038_s1 + $0x18] sm:$0xff]  ;;  %v76_v6 = vld [vmem:[%s3038_s1 + $0x20] sm:$0xff] }
  0x14   :  { %v2254_v5 = vpack.c.bf16 %v75_v4, %v74_v2  ;;  %v77_v7 = vld [vmem:[%s3038_s1 + $0x28] sm:$0xff]  ;;  %v40_v9 = vld [vmem:[%s3037_s0] sm:$0xff]  ;;  %v78_v10 = vld [vmem:[%s3038_s1 + $0x30] sm:$0xff] }
  0x15   :  { %2251 = vmatprep.subr.bf16.mxu1 %v2250_v3  ;;  %v2258_v8 = vpack.c.bf16 %v77_v7, %v76_v6  ;;  %v79_v11 = vld [vmem:[%s3038_s1 + $0x38] sm:$0xff]  ;;  %1818 = vmatprep.mubr.f32.mxu1 %v40_v9  ;;  %v80_v13 = vld [vmem:[%s3038_s1 + $0x40] sm:$0xff]  ;;  %v81_v14 = vld [vmem:[%s3038_s1 + $0x48] sm:$0xff] }
  0x16   :  { %2253 = vmatpush3.bf16.msra.mxu1 %v2250_v3  ;;  %v2262_v12 = vpack.c.bf16 %v79_v11, %v78_v10  ;;  %v2266_v15 = vpack.c.bf16 %v81_v14, %v80_v13  ;;  %v82_v16 = vld [vmem:[%s3038_s1 + $0x50] sm:$0xff]  ;;  %v83_v17 = vld [vmem:[%s3038_s1 + $0x58] sm:$0xff]  ;;  %v84_v19 = vld [vmem:[%s3038_s1 + $0x60] sm:$0xff] }
  0x17   :  { %2255 = vmatprep.subr.bf16.mxu1 %v2254_v5  ;;  %v2270_v18 = vpack.c.bf16 %v83_v17, %v82_v16  ;;  %v85_v20 = vld [vmem:[%s3038_s1 + $0x68] sm:$0xff]  ;;  %v86_v22 = vld [vmem:[%s3038_s1 + $0x70] sm:$0xff]  ;;  %v87_v23 = vld [vmem:[%s3038_s1 + $0x78] sm:$0xff] }
  0x18   :  { %v2274_v21 = vpack.c.bf16 %v85_v20, %v84_v19  ;;  %v2278_v24 = vpack.c.bf16 %v87_v23, %v86_v22  ;;  %v352_v25 = vld [vmem:[%s3040_s3] sm:$0xff]  ;;  %v353_v26 = vld [vmem:[%s3040_s3 + $0x8] sm:$0xff]  ;;  %v354_v28 = vld [vmem:[%s3040_s3 + $0x10] sm:$0xff] }
  0x19   :  { %v2282_v27 = vpack.c.bf16 %v353_v26, %v352_v25  ;;  %v355_v29 = vld [vmem:[%s3040_s3 + $0x18] sm:$0xff]  ;;  %v41_v30 = vld [vmem:[%s3037_s0 + $0x8] sm:$0xff]  ;;  %v42_v31 = vld [vmem:[%s3037_s0 + $0x10] sm:$0xff] }
  0x1a   :  { %2257 = vmatpush3.bf16.msra.mxu1 %v2254_v5  ;;  %v2286_v32 = vpack.c.bf16 %v355_v29, %v354_v28  ;;  %v356_v33 = vld [vmem:[%s3040_s3 + $0x20] sm:$0xff]  ;;  %v357_v34 = vld [vmem:[%s3040_s3 + $0x28] sm:$0xff]  ;;  %v43_v35 = vld [vmem:[%s3037_s0 + $0x18] sm:$0xff] }
  0x1b   :  { %2259 = vmatprep.subr.bf16.mxu1 %v2258_v8  ;;  %v44_v36 = vld [vmem:[%s3037_s0 + $0x20] sm:$0xff]  ;;  %v2290_v37 = vpack.c.bf16 %v357_v34, %v356_v33  ;;  %v358_v38 = vld [vmem:[%s3040_s3 + $0x30] sm:$0xff]  ;;  %v359_v39 = vld [vmem:[%s3040_s3 + $0x38] sm:$0xff] }
  0x1c   :  { %v45_v40 = vld [vmem:[%s3037_s0 + $0x28] sm:$0xff]  ;;  %v46_v41 = vld [vmem:[%s3037_s0 + $0x30] sm:$0xff]  ;;  %v2294_v42 = vpack.c.bf16 %v359_v39, %v358_v38  ;;  %v360_v43 = vld [vmem:[%s3040_s3 + $0x40] sm:$0xff] }
  0x1d   :  { %v361_v44 = vld [vmem:[%s3040_s3 + $0x48] sm:$0xff]  ;;  %v47_v45 = vld [vmem:[%s3037_s0 + $0x38] sm:$0xff]  ;;  %v48_v46 = vld [vmem:[%s3037_s0 + $0x40] sm:$0xff] }
  0x1e   :  { %2261 = vmatpush3.bf16.msra.mxu1 %v2258_v8  ;;  %v2298_v47 = vpack.c.bf16 %v361_v44, %v360_v43  ;;  %v362_v48 = vld [vmem:[%s3040_s3 + $0x50] sm:$0xff]  ;;  %v363_v49 = vld [vmem:[%s3040_s3 + $0x58] sm:$0xff]  ;;  %v49_v50 = vld [vmem:[%s3037_s0 + $0x48] sm:$0xff] }
  0x1f   :  { %2263 = vmatprep.subr.bf16.mxu1 %v2262_v12  ;;  %v50_v51 = vld [vmem:[%s3037_s0 + $0x50] sm:$0xff]  ;;  %v2302_v52 = vpack.c.bf16 %v363_v49, %v362_v48  ;;  %v364_v53 = vld [vmem:[%s3040_s3 + $0x60] sm:$0xff]  ;;  %v365_v54 = vld [vmem:[%s3040_s3 + $0x68] sm:$0xff] }
  0x20   :  { %v51_v55 = vld [vmem:[%s3037_s0 + $0x58] sm:$0xff]  ;;  %v52_v56 = vld [vmem:[%s3037_s0 + $0x60] sm:$0xff]  ;;  %v2306_v57 = vpack.c.bf16 %v365_v54, %v364_v53  ;;  %v366_v58 = vld [vmem:[%s3040_s3 + $0x70] sm:$0xff] }
  0x21   :  { %v367_v59 = vld [vmem:[%s3040_s3 + $0x78] sm:$0xff]  ;;  %v53_v60 = vld [vmem:[%s3037_s0 + $0x68] sm:$0xff]  ;;  %v54_v61 = vld [vmem:[%s3037_s0 + $0x70] sm:$0xff] }
  0x22   :  { %2265 = vmatpush3.bf16.msra.mxu1 %v2262_v12  ;;  %v2310_v62 = vpack.c.bf16 %v367_v59, %v366_v58  ;;  %v55_v63 = vld [vmem:[%s3037_s0 + $0x78] sm:$0xff]  ;;  %v56_v0 = vld [vmem:[%s3037_s0 + $0x80] sm:$0xff]  ;;  %v57_v1 = vld [vmem:[%s3037_s0 + $0x88] sm:$0xff] }
  0x23   :  { %2267 = vmatprep.subr.bf16.mxu1 %v2266_v15  ;;  %v58_v2 = vld [vmem:[%s3037_s0 + $0x90] sm:$0xff]  ;;  %v59_v3 = vld [vmem:[%s3037_s0 + $0x98] sm:$0xff]  ;;  %v60_v4 = vld [vmem:[%s3037_s0 + $0xa0] sm:$0xff] }
  0x24   :  { %v61_v5 = vld [vmem:[%s3037_s0 + $0xa8] sm:$0xff]  ;;  %v62_v6 = vld [vmem:[%s3037_s0 + $0xb0] sm:$0xff]  ;;  %v63_v7 = vld [vmem:[%s3037_s0 + $0xb8] sm:$0xff] }
  0x25   :  { %v64_v8 = vld [vmem:[%s3037_s0 + $0xc0] sm:$0xff]  ;;  %v65_v9 = vld [vmem:[%s3037_s0 + $0xc8] sm:$0xff]  ;;  %v66_v10 = vld [vmem:[%s3037_s0 + $0xd0] sm:$0xff] }
  0x26   :  { %2269 = vmatpush3.bf16.msra.mxu1 %v2266_v15  ;;  %v67_v11 = vld [vmem:[%s3037_s0 + $0xd8] sm:$0xff]  ;;  %v68_v12 = vld [vmem:[%s3037_s0 + $0xe0] sm:$0xff]  ;;  %v69_v13 = vld [vmem:[%s3037_s0 + $0xe8] sm:$0xff] }
  0x27   :  { %2271 = vmatprep.subr.bf16.mxu1 %v2270_v18  ;;  %v70_v14 = vld [vmem:[%s3037_s0 + $0xf0] sm:$0xff]  ;;  %v71_v15 = vld [vmem:[%s3037_s0 + $0xf8] sm:$0xff]  ;;  %v649_v16 = vld [vmem:[#allocation2 + $0x80] sm:$0xff] }
  0x28   :  { %v650_v17 = vld [vmem:[#allocation2 + $0x88] sm:$0xff]  ;;  %v836_v19 = vld [vmem:[#allocation2 + $0x100] sm:$0xff]  ;;  %v838_v22 = vld [vmem:[#allocation2 + $0x110] sm:$0xff] }
  0x29   :  { %v837_v20 = vld [vmem:[#allocation2 + $0x108] sm:$0xff]  ;;  %v839_v23 = vld [vmem:[#allocation2 + $0x118] sm:$0xff]  ;;  %v840_v25 = vld [vmem:[#allocation2 + $0x120] sm:$0xff] }
  0x2a   :  { %2273 = vmatpush3.bf16.msra.mxu1 %v2270_v18  ;;  %v2314_v18 = vpack.c.bf16 %v650_v17, %v649_v16  ;;  %v841_v26 = vld [vmem:[#allocation2 + $0x128] sm:$0xff]  ;;  %v2891_v28 = vld [vmem:[%s3039_s2] ss:$0 sm:$0xff]  ;;  %v651_v33 = vld [vmem:[#allocation2 + $0x90] sm:$0xff] }
  0x2b   :  { %2275 = vmatprep.subr.bf16.mxu1 %v2274_v21  ;;  %v652_v34 = vld [vmem:[#allocation2 + $0x98] sm:$0xff]  ;;  %v654_v43 = vld [vmem:[#allocation2 + $0xa8] sm:$0xff] }
  0x2e   :  { %2277 = vmatpush3.bf16.msra.mxu1 %v2274_v21  ;;  %v2378_v21 = vpack.c.bf16 %v837_v20, %v836_v19 }
  0x2f   :  { %2279 = vmatprep.subr.bf16.mxu1 %v2278_v24 }
  0x30   :  { %2379 = vmatprep.subr.bf16.mxu0 %v2378_v21 }
  0x31   :  { %2381 = vmatpush3.bf16.msra.mxu0 %v2378_v21 }
  0x32   :  { %2281 = vmatpush3.bf16.msra.mxu1 %v2278_v24  ;;  %v2382_v24 = vpack.c.bf16 %v839_v23, %v838_v22 }
  0x33   :  { %2283 = vmatprep.subr.bf16.mxu1 %v2282_v27 }
  0x34   :  { %2383 = vmatprep.subr.bf16.mxu0 %v2382_v24 }
  0x35   :  { %1819 = vmatmul.mubr.f32.vlgmr.msra.gmra.mrb[0].mxu1 %v41_v30  ;;  %2385 = vmatpush3.bf16.msra.mxu0 %v2382_v24 }
  0x36   :  { %1821 = vmatprep.mubr.f32.mxu1 %v42_v31  ;;  %2285 = vmatpush3.bf16.msra.mxu1 %v2282_v27  ;;  %v2386_v27 = vpack.c.bf16 %v841_v26, %v840_v25 }
  0x37   :  { %2287 = vmatprep.subr.bf16.mxu1 %v2286_v32 }
  0x38   :  { %2387 = vmatprep.subr.bf16.mxu0 %v2386_v27 }
  0x39   :  { %1822 = vmatmul.mubr.f32.gmra.mrb[2].mxu1 %v43_v35  ;;  %2389 = vmatpush3.bf16.msra.mxu0 %v2386_v27 }
  0x3a   :  { %1824 = vmatprep.mubr.f32.mxu1 %v44_v36  ;;  %2289 = vmatpush3.bf16.msra.mxu1 %v2286_v32 }
  0x3b   :  { %2291 = vmatprep.subr.bf16.mxu1 %v2290_v37 }
  0x3d   :  { %1825 = vmatmul.mubr.f32.gmra.mrb[4].mxu1 %v45_v40  ;;  %v2318_v40 = vpack.c.bf16 %v652_v34, %v651_v33 }
  0x3e   :  { %1827 = vmatprep.mubr.f32.mxu1 %v46_v41  ;;  %2293 = vmatpush3.bf16.msra.mxu1 %v2290_v37 }
  0x3f   :  { %2295 = vmatprep.subr.bf16.mxu1 %v2294_v42 }
  0x41   :  { %1828 = vmatmul.mubr.f32.gmra.mrb[6].mxu1 %v47_v45 }
  0x42   :  { %1830 = vmatprep.mubr.f32.mxu1 %v48_v46  ;;  %2297 = vmatpush3.bf16.msra.mxu1 %v2294_v42  ;;  %v653_v42 = vld [vmem:[#allocation2 + $0xa0] sm:$0xff] }
  0x43   :  { %2299 = vmatprep.subr.bf16.mxu1 %v2298_v47  ;;  %v2322_v49 = vpack.c.bf16 %v654_v43, %v653_v42 }
  0x45   :  { %1831 = vmatmul.mubr.f32.gmra.mrb[8].mxu1 %v49_v50 }
  0x46   :  { %1833 = vmatprep.mubr.f32.mxu1 %v50_v51  ;;  %2301 = vmatpush3.bf16.msra.mxu1 %v2298_v47  ;;  %v655_v51 = vld [vmem:[#allocation2 + $0xb0] sm:$0xff] }
  0x47   :  { %2303 = vmatprep.subr.bf16.mxu1 %v2302_v52 }
  0x49   :  { %1834 = vmatmul.mubr.f32.gmra.mrb[10].mxu1 %v51_v55 }
  0x4a   :  { %1836 = vmatprep.mubr.f32.mxu1 %v52_v56  ;;  %2305 = vmatpush3.bf16.msra.mxu1 %v2302_v52  ;;  %v656_v52 = vld [vmem:[#allocation2 + $0xb8] sm:$0xff] }
  0x4b   :  { %2307 = vmatprep.subr.bf16.mxu1 %v2306_v57  ;;  %v2326_v58 = vpack.c.bf16 %v656_v52, %v655_v51 }
  0x4d   :  { %1837 = vmatmul.mubr.f32.gmra.mrb[12].mxu1 %v53_v60  ;;  %v657_v60 = vld [vmem:[#allocation2 + $0xc0] sm:$0xff] }
  0x4e   :  { %1839 = vmatprep.mubr.f32.mxu1 %v54_v61  ;;  %2309 = vmatpush3.bf16.msra.mxu1 %v2306_v57  ;;  %v658_v61 = vld [vmem:[#allocation2 + $0xc8] sm:$0xff] }
  0x4f   :  { %2311 = vmatprep.subr.bf16.mxu1 %v2310_v62 }
  0x51   :  { %1840 = vmatmul.mubr.f32.gmra.mrb[14].mxu1 %v55_v63 }
  0x52   :  { %1842 = vmatprep.mubr.f32.mxu1 %v56_v0  ;;  %2313 = vmatpush3.bf16.msra.mxu1 %v2310_v62 }
  0x53   :  { %2315 = vmatprep.subr.bf16.mxu1 %v2314_v18 }
  0x55   :  { %1843 = vmatmul.mubr.f32.gmra.mrb[16].mxu1 %v57_v1 }
  0x56   :  { %1845 = vmatprep.mubr.f32.mxu1 %v58_v2 }
  0x59   :  { %1846 = vmatmul.mubr.f32.gmra.mrb[18].mxu1 %v59_v3  ;;  %v2330_v3 = vpack.c.bf16 %v658_v61, %v657_v60 }
  0x5a   :  { %1848 = vmatprep.mubr.f32.mxu1 %v60_v4 }
  0x5d   :  { %1849 = vmatmul.mubr.f32.gmra.mrb[20].mxu1 %v61_v5 }
  0x5e   :  { %1851 = vmatprep.mubr.f32.mxu1 %v62_v6 }
  0x61   :  { %1852 = vmatmul.mubr.f32.gmra.mrb[22].mxu1 %v63_v7 }
  0x62   :  { %1854 = vmatprep.mubr.f32.mxu1 %v64_v8 }
  0x65   :  { %1855 = vmatmul.mubr.f32.gmra.mrb[24].mxu1 %v65_v9 }
  0x66   :  { %1857 = vmatprep.mubr.f32.mxu1 %v66_v10 }
  0x69   :  { %1858 = vmatmul.mubr.f32.gmra.mrb[26].mxu1 %v67_v11 }
  0x6a   :  { %1860 = vmatprep.mubr.f32.mxu1 %v68_v12 }
  0x6d   :  { %1861 = vmatmul.mubr.f32.gmra.mrb[28].mxu1 %v69_v13 }
  0x6e   :  { %1863 = vmatprep.mubr.f32.mxu1 %v70_v14 }
  0x71   :  { %1864 = vmatmul.mubr.f32.gmra.mrb[30].mxu1 %v71_v15 }
 0x108   :  { %v1820_v29 = vpop.f32.mrb[0].mxu1 }
 0x109   :  { %v167_v30 = vadd.f32 %v1820_v29, %v2891_v28  ;;  %v161_v31 = vpop.f32.mrb[1].mxu1 }
 0x10a   :  { %v162_v32 = vadd.f32 %v2891_v28, %v161_v31 }
 0x10b   :  { %v321_v37 = vmax.f32 %v167_v30, 0.0 }
 0x10c   :  { %v320_v35 = vmax.f32 %v162_v32, 0.0  ;;  %v1823_v36 = vpop.f32.mrb[2].mxu1 }
 0x10d   :  { %v177_v38 = vadd.f32 %v1823_v36, %v2891_v28  ;;  %v171_v39 = vpop.f32.mrb[3].mxu1 }
 0x10e   :  { %v172_v41 = vadd.f32 %v2891_v28, %v171_v39  ;;  %1898 = vmatprep.mubr.f32.mxu1 %v320_v35 }
 0x10f   :  { %1899 = vmatmul.mubr.f32.vlgmr.msra.gmra.mrb[32].mxu1 %v321_v37  ;;  %v323_v46 = vmax.f32 %v177_v38, 0.0 }
 0x110   :  { %v322_v44 = vmax.f32 %v172_v41, 0.0  ;;  %v1826_v45 = vpop.f32.mrb[4].mxu1  ;;  %2317 = vmatpush3.bf16.msra.mxu1 %v2314_v18 }
 0x111   :  { %v187_v47 = vadd.f32 %v1826_v45, %v2891_v28  ;;  %v181_v48 = vpop.f32.mrb[5].mxu1  ;;  %2319 = vmatprep.subr.bf16.mxu1 %v2318_v40 }
 0x112   :  { %v182_v50 = vadd.f32 %v2891_v28, %v181_v48  ;;  %1901 = vmatprep.mubr.f32.mxu1 %v322_v44 }
 0x113   :  { %1902 = vmatmul.mubr.f32.gmra.mrb[34].mxu1 %v323_v46  ;;  %v325_v55 = vmax.f32 %v187_v47, 0.0 }
 0x114   :  { %v324_v53 = vmax.f32 %v182_v50, 0.0  ;;  %v1829_v54 = vpop.f32.mrb[6].mxu1  ;;  %2321 = vmatpush3.bf16.msra.mxu1 %v2318_v40 }
 0x115   :  { %v197_v56 = vadd.f32 %v1829_v54, %v2891_v28  ;;  %v191_v57 = vpop.f32.mrb[7].mxu1  ;;  %2323 = vmatprep.subr.bf16.mxu1 %v2322_v49 }
 0x116   :  { %v192_v59 = vadd.f32 %v2891_v28, %v191_v57  ;;  %1904 = vmatprep.mubr.f32.mxu1 %v324_v53 }
 0x117   :  { %1905 = vmatmul.mubr.f32.gmra.mrb[36].mxu1 %v325_v55  ;;  %v327_v0 = vmax.f32 %v197_v56, 0.0 }
 0x118   :  { %v326_v62 = vmax.f32 %v192_v59, 0.0  ;;  %v1832_v63 = vpop.f32.mrb[8].mxu1  ;;  %2325 = vmatpush3.bf16.msra.mxu1 %v2322_v49 }
 0x119   :  { %v207_v1 = vadd.f32 %v1832_v63, %v2891_v28  ;;  %v201_v2 = vpop.f32.mrb[9].mxu1  ;;  %2327 = vmatprep.subr.bf16.mxu1 %v2326_v58 }
 0x11a   :  { %v202_v4 = vadd.f32 %v2891_v28, %v201_v2  ;;  %1907 = vmatprep.mubr.f32.mxu1 %v326_v62 }
 0x11b   :  { %1908 = vmatmul.mubr.f32.gmra.mrb[38].mxu1 %v327_v0  ;;  %v329_v7 = vmax.f32 %v207_v1, 0.0 }
 0x11c   :  { %v328_v5 = vmax.f32 %v202_v4, 0.0  ;;  %v1835_v6 = vpop.f32.mrb[10].mxu1  ;;  %2329 = vmatpush3.bf16.msra.mxu1 %v2326_v58 }
 0x11d   :  { %v217_v8 = vadd.f32 %v1835_v6, %v2891_v28  ;;  %v211_v9 = vpop.f32.mrb[11].mxu1  ;;  %2331 = vmatprep.subr.bf16.mxu1 %v2330_v3 }
 0x11e   :  { %1910 = vmatprep.mubr.f32.mxu1 %v328_v5  ;;  %v212_v10 = vadd.f32 %v2891_v28, %v211_v9 }
 0x11f   :  { %1911 = vmatmul.mubr.f32.gmra.mrb[40].mxu1 %v329_v7  ;;  %v331_v11 = vmax.f32 %v217_v8, 0.0 }
 0x120   :  { %v330_v12 = vmax.f32 %v212_v10, 0.0  ;;  %v1838_v13 = vpop.f32.mrb[12].mxu1  ;;  %2333 = vmatpush3.bf16.msra.mxu1 %v2330_v3  ;;  %v659_v10 = vld [vmem:[#allocation2 + $0xd0] sm:$0xff] }
 0x121   :  { %v227_v14 = vadd.f32 %v1838_v13, %v2891_v28  ;;  %v221_v15 = vpop.f32.mrb[13].mxu1 }
 0x122   :  { %v222_v16 = vadd.f32 %v2891_v28, %v221_v15  ;;  %1913 = vmatprep.mubr.f32.mxu1 %v330_v12  ;;  %v842_v12 = vld [vmem:[#allocation2 + $0x130] sm:$0xff] }
 0x123   :  { %v333_v17 = vmax.f32 %v227_v14, 0.0  ;;  %1914 = vmatmul.mubr.f32.gmra.mrb[42].mxu1 %v331_v11  ;;  %v660_v11 = vld [vmem:[#allocation2 + $0xd8] sm:$0xff] }
 0x124   :  { %v332_v18 = vmax.f32 %v222_v16, 0.0  ;;  %v1841_v19 = vpop.f32.mrb[14].mxu1  ;;  %v2334_v13 = vpack.c.bf16 %v660_v11, %v659_v10  ;;  %v843_v14 = vld [vmem:[#allocation2 + $0x138] sm:$0xff]  ;;  %v661_v16 = vld [vmem:[#allocation2 + $0xe0] sm:$0xff] }
 0x125   :  { %v237_v20 = vadd.f32 %v1841_v19, %v2891_v28  ;;  %v231_v21 = vpop.f32.mrb[15].mxu1  ;;  %v2390_v15 = vpack.c.bf16 %v843_v14, %v842_v12  ;;  %v845_v19 = vld [vmem:[#allocation2 + $0x148] sm:$0xff]  ;;  %v640_v14 = vld [vmem:[#allocation2 + $0x40] sm:$0xff] }
 0x126   :  { %1916 = vmatprep.mubr.f32.mxu1 %v332_v18  ;;  %v232_v22 = vadd.f32 %v2891_v28, %v231_v21  ;;  %2335 = vmatprep.subr.bf16.mxu1 %v2334_v13  ;;  %v844_v18 = vld [vmem:[#allocation2 + $0x140] sm:$0xff]  ;;  %v663_v21 = vld [vmem:[#allocation2 + $0xf0] sm:$0xff] }
 0x127   :  { %1917 = vmatmul.mubr.f32.gmra.mrb[44].mxu1 %v333_v17  ;;  %v335_v23 = vmax.f32 %v237_v20, 0.0  ;;  %2391 = vmatprep.subr.bf16.mxu0 %v2390_v15  ;;  %v662_v17 = vld [vmem:[#allocation2 + $0xe8] sm:$0xff]  ;;  %v2394_v20 = vpack.c.bf16 %v845_v19, %v844_v18  ;;  %v946_v18 = vld [vmem:[#allocation2 + $0x1a0] sm:$0xff] }
 0x128   :  { %v334_v24 = vmax.f32 %v232_v22, 0.0  ;;  %v1844_v25 = vpop.f32.mrb[16].mxu1  ;;  %2337 = vmatpush3.bf16.msra.mxu1 %v2334_v13  ;;  %2393 = vmatpush3.bf16.msra.mxu0 %v2390_v15  ;;  %v664_v22 = vld [vmem:[#allocation2 + $0xf8] sm:$0xff] }
 0x129   :  { %v247_v26 = vadd.f32 %v1844_v25, %v2891_v28  ;;  %v241_v27 = vpop.f32.mrb[17].mxu1  ;;  %2395 = vmatprep.subr.bf16.mxu0 %v2394_v20  ;;  %v847_v25 = vld [vmem:[#allocation2 + $0x158] sm:$0xff] }
 0x12a   :  { %v242_v29 = vadd.f32 %v2891_v28, %v241_v27  ;;  %1919 = vmatprep.mubr.f32.mxu1 %v334_v24  ;;  %v2342_v24 = vpack.c.bf16 %v664_v22, %v663_v21  ;;  %v632_v27 = vld [vmem:[#allocation2] sm:$0xff] }
 0x12b   :  { %v337_v30 = vmax.f32 %v247_v26, 0.0  ;;  %1920 = vmatmul.mubr.f32.gmra.mrb[46].mxu1 %v335_v23  ;;  %v846_v23 = vld [vmem:[#allocation2 + $0x150] sm:$0xff] }
 0x12c   :  { %v336_v31 = vmax.f32 %v242_v29, 0.0  ;;  %v1847_v32 = vpop.f32.mrb[18].mxu1  ;;  %2397 = vmatpush3.bf16.msra.mxu0 %v2394_v20  ;;  %v2398_v26 = vpack.c.bf16 %v847_v25, %v846_v23  ;;  %v633_v29 = vld [vmem:[#allocation2 + $0x8] sm:$0xff]  ;;  %v642_v25 = vld [vmem:[#allocation2 + $0x50] sm:$0xff] }
 0x12d   :  { %v257_v33 = vadd.f32 %v1847_v32, %v2891_v28  ;;  %v251_v34 = vpop.f32.mrb[19].mxu1  ;;  %v849_v32 = vld [vmem:[#allocation2 + $0x168] sm:$0xff] }
 0x12e   :  { %1922 = vmatprep.mubr.f32.mxu1 %v336_v31  ;;  %v252_v35 = vadd.f32 %v2891_v28, %v251_v34  ;;  %2399 = vmatprep.subr.bf16.mxu0 %v2398_v26  ;;  %v2346_v31 = vpack.c.bf16 %v633_v29, %v632_v27  ;;  %v850_v34 = vld [vmem:[#allocation2 + $0x170] sm:$0xff]  ;;  %v643_v27 = vld [vmem:[#allocation2 + $0x58] sm:$0xff] }
 0x12f   :  { %1923 = vmatmul.mubr.f32.gmra.mrb[48].mxu1 %v337_v30  ;;  %v339_v36 = vmax.f32 %v257_v33, 0.0  ;;  %v848_v30 = vld [vmem:[#allocation2 + $0x160] sm:$0xff]  ;;  %v948_v29 = vld [vmem:[#allocation2 + $0x1b0] sm:$0xff] }
 0x130   :  { %v338_v37 = vmax.f32 %v252_v35, 0.0  ;;  %v1850_v38 = vpop.f32.mrb[20].mxu1  ;;  %2401 = vmatpush3.bf16.msra.mxu0 %v2398_v26  ;;  %v2402_v33 = vpack.c.bf16 %v849_v32, %v848_v30  ;;  %v851_v35 = vld [vmem:[#allocation2 + $0x178] sm:$0xff] }
 0x131   :  { %v267_v39 = vadd.f32 %v1850_v38, %v2891_v28  ;;  %v261_v40 = vpop.f32.mrb[21].mxu1  ;;  %v943_v38 = vld [vmem:[#allocation2 + $0x188] sm:$0xff]  ;;  %v949_v30 = vld [vmem:[#allocation2 + $0x1b8] sm:$0xff] }
 0x132   :  { %v262_v41 = vadd.f32 %v2891_v28, %v261_v40  ;;  %1925 = vmatprep.mubr.f32.mxu1 %v338_v37  ;;  %2403 = vmatprep.subr.bf16.mxu0 %v2402_v33  ;;  %v942_v37 = vld [vmem:[#allocation2 + $0x180] sm:$0xff] }
 0x133   :  { %v341_v42 = vmax.f32 %v267_v39, 0.0  ;;  %1926 = vmatmul.mubr.f32.gmra.mrb[50].mxu1 %v339_v36  ;;  %v2406_v36 = vpack.c.bf16 %v851_v35, %v850_v34  ;;  %v2410_v39 = vpack.c.bf16 %v943_v38, %v942_v37  ;;  %v2366_v34 = vpack.c.bf16 %v643_v27, %v642_v25  ;;  %v645_v38 = vld [vmem:[#allocation2 + $0x68] sm:$0xff] }
 0x134   :  { %v340_v43 = vmax.f32 %v262_v41, 0.0  ;;  %v1853_v44 = vpop.f32.mrb[22].mxu1  ;;  %2405 = vmatpush3.bf16.msra.mxu0 %v2402_v33  ;;  %v2422_v35 = vpack.c.bf16 %v949_v30, %v948_v29 }
 0x135   :  { %v277_v45 = vadd.f32 %v1853_v44, %v2891_v28  ;;  %v271_v46 = vpop.f32.mrb[23].mxu1  ;;  %2407 = vmatprep.subr.bf16.mxu0 %v2406_v36  ;;  %v2934_v44 = vld [vmem:[%s3041_s4] ss:$0 sm:$0xff] }
 0x136   :  { %1928 = vmatprep.mubr.f32.mxu1 %v340_v43  ;;  %v272_v47 = vadd.f32 %v2891_v28, %v271_v46 }
 0x137   :  { %1929 = vmatmul.mubr.f32.gmra.mrb[52].mxu1 %v341_v42  ;;  %v343_v48 = vmax.f32 %v277_v45, 0.0 }
 0x138   :  { %v342_v49 = vmax.f32 %v272_v47, 0.0  ;;  %v1856_v50 = vpop.f32.mrb[24].mxu1  ;;  %2409 = vmatpush3.bf16.msra.mxu0 %v2406_v36  ;;  %v644_v36 = vld [vmem:[#allocation2 + $0x60] sm:$0xff] }
 0x139   :  { %v287_v51 = vadd.f32 %v1856_v50, %v2891_v28  ;;  %v281_v52 = vpop.f32.mrb[25].mxu1  ;;  %2411 = vmatprep.subr.bf16.mxu0 %v2410_v39  ;;  %v635_v50 = vld [vmem:[#allocation2 + $0x18] sm:$0xff] }
 0x13a   :  { %v282_v53 = vadd.f32 %v2891_v28, %v281_v52  ;;  %1931 = vmatprep.mubr.f32.mxu1 %v342_v49  ;;  %v634_v49 = vld [vmem:[#allocation2 + $0x10] sm:$0xff] }
 0x13b   :  { %v345_v54 = vmax.f32 %v287_v51, 0.0  ;;  %1932 = vmatmul.mubr.f32.gmra.mrb[54].mxu1 %v343_v48 }
 0x13c   :  { %v344_v55 = vmax.f32 %v282_v53, 0.0  ;;  %v1859_v56 = vpop.f32.mrb[26].mxu1 }
 0x13d   :  { %v297_v57 = vadd.f32 %v1859_v56, %v2891_v28  ;;  %v291_v58 = vpop.f32.mrb[27].mxu1  ;;  %v2350_v56 = vpack.c.bf16 %v635_v50, %v634_v49 }
 0x13e   :  { %1934 = vmatprep.mubr.f32.mxu1 %v344_v55  ;;  %v292_v59 = vadd.f32 %v2891_v28, %v291_v58 }
 0x13f   :  { %1935 = vmatmul.mubr.f32.gmra.mrb[56].mxu1 %v345_v54  ;;  %v347_v60 = vmax.f32 %v297_v57, 0.0 }
 0x140   :  { %v346_v61 = vmax.f32 %v292_v59, 0.0  ;;  %v1862_v62 = vpop.f32.mrb[28].mxu1  ;;  %v636_v59 = vld [vmem:[#allocation2 + $0x20] sm:$0xff] }
 0x141   :  { %v307_v63 = vadd.f32 %v1862_v62, %v2891_v28  ;;  %v301_v0 = vpop.f32.mrb[29].mxu1 }
 0x142   :  { %v302_v1 = vadd.f32 %v2891_v28, %v301_v0  ;;  %1937 = vmatprep.mubr.f32.mxu1 %v346_v61 }
 0x143   :  { %v349_v2 = vmax.f32 %v307_v63, 0.0  ;;  %1938 = vmatmul.mubr.f32.gmra.mrb[58].mxu1 %v347_v60  ;;  %v637_v60 = vld [vmem:[#allocation2 + $0x28] sm:$0xff] }
 0x144   :  { %v348_v3 = vmax.f32 %v302_v1, 0.0  ;;  %v1865_v4 = vpop.f32.mrb[30].mxu1 }
 0x145   :  { %v317_v5 = vadd.f32 %v1865_v4, %v2891_v28  ;;  %v311_v6 = vpop.f32.mrb[31].mxu1 }
 0x146   :  { %v312_v7 = vadd.f32 %v2891_v28, %v311_v6  ;;  %1940 = vmatprep.mubr.f32.mxu1 %v348_v3  ;;  %v2338_v28 = vpack.c.bf16 %v662_v17, %v661_v16  ;;  %v638_v3 = vld [vmem:[#allocation2 + $0x30] sm:$0xff]  ;;  %v639_v6 = vld [vmem:[#allocation2 + $0x38] sm:$0xff]  ;;  %v641_v17 = vld [vmem:[#allocation2 + $0x48] sm:$0xff] }
 0x147   :  { %v351_v8 = vmax.f32 %v317_v5, 0.0  ;;  %1941 = vmatmul.mubr.f32.gmra.mrb[60].mxu1 %v349_v2  ;;  %v2354_v2 = vpack.c.bf16 %v637_v60, %v636_v59  ;;  %v2358_v12 = vpack.c.bf16 %v639_v6, %v638_v3  ;;  %v2362_v23 = vpack.c.bf16 %v641_v17, %v640_v14  ;;  %v954_v59 = vld [vmem:[#allocation2 + $0x1e0] sm:$0xff]  ;;  %v955_v60 = vld [vmem:[#allocation2 + $0x1e8] sm:$0xff] }
 0x148   :  { %v350_v9 = vmax.f32 %v312_v7, 0.0  ;;  %2339 = vmatprep.subr.bf16.mxu1 %v2338_v28  ;;  %v944_v7 = vld [vmem:[#allocation2 + $0x190] sm:$0xff] }
 0x149   :  { %2341 = vmatpush3.bf16.msra.mxu1 %v2338_v28  ;;  %v947_v28 = vld [vmem:[#allocation2 + $0x1a8] sm:$0xff] }
 0x14a   :  { %1943 = vmatprep.mubr.f32.mxu1 %v350_v9  ;;  %2343 = vmatprep.subr.bf16.mxu1 %v2342_v24 }
 0x14b   :  { %1944 = vmatmul.mubr.f32.gmra.mrb[62].mxu1 %v351_v8  ;;  %v945_v8 = vld [vmem:[#allocation2 + $0x198] sm:$0xff] }
 0x14c   :  { %v2414_v13 = vpack.c.bf16 %v945_v8, %v944_v7 }
 0x14d   :  { %2345 = vmatpush3.bf16.msra.mxu1 %v2342_v24  ;;  %v2418_v24 = vpack.c.bf16 %v947_v28, %v946_v18 }
 0x14e   :  { %2347 = vmatprep.subr.bf16.mxu1 %v2346_v31 }
 0x1e2   :  { %v2925_v40 = vpop.f32.mrb[32].mxu1 }
 0x1e3   :  { %v441_v41 = vpop.f32.mrb[33].mxu1 }
 0x1e4   :  { %v442_v57 = vadd.f32 %v2934_v44, %v441_v41  ;;  %v951_v41 = vld [vmem:[#allocation2 + $0x1c8] sm:$0xff] }
 0x1e6   :  { %v2927_v42 = vpop.f32.mrb[34].mxu1  ;;  %v600_v4 = vmax.f32 %v442_v57, 0.0 }
 0x1e7   :  { %v2929_v43 = vpop.f32.mrb[35].mxu1 }
 0x1e8   :  { %v452_v3 = vadd.f32 %v2934_v44, %v2929_v43  ;;  %v1048_v43 = vld [vmem:[#allocation2 + $0x200] sm:$0xff] }
 0x1ea   :  { %v1906_v45 = vpop.f32.mrb[36].mxu1 }
 0x1eb   :  { %v467_v46 = vadd.f32 %v1906_v45, %v2934_v44  ;;  %v461_v47 = vpop.f32.mrb[37].mxu1 }
 0x1ec   :  { %v462_v48 = vadd.f32 %v2934_v44, %v461_v47 }
 0x1ed   :  { %v605_v53 = vmax.f32 %v467_v46, 0.0  ;;  %v2370_v46 = vpack.c.bf16 %v645_v38, %v644_v36 }
 0x1ee   :  { %v604_v51 = vmax.f32 %v462_v48, 0.0  ;;  %v1909_v52 = vpop.f32.mrb[38].mxu1  ;;  %v646_v48 = vld [vmem:[#allocation2 + $0x70] sm:$0xff] }
 0x1ef   :  { %v477_v54 = vadd.f32 %v1909_v52, %v2934_v44  ;;  %v471_v55 = vpop.f32.mrb[39].mxu1  ;;  %v952_v52 = vld [vmem:[#allocation2 + $0x1d0] sm:$0xff] }
 0x1f0   :  { %v472_v58 = vadd.f32 %v2934_v44, %v471_v55  ;;  %1978 = vmatprep.mubr.f32.mxu1 %v604_v51  ;;  %v647_v51 = vld [vmem:[#allocation2 + $0x78] sm:$0xff] }
 0x1f1   :  { %1979 = vmatmul.mubr.f32.vlgmr.msra.gmra.mrb[64].mxu1 %v605_v53  ;;  %v607_v63 = vmax.f32 %v477_v54, 0.0  ;;  %v953_v53 = vld [vmem:[#allocation2 + $0x1d8] sm:$0xff]  ;;  %v2374_v55 = vpack.c.bf16 %v647_v51, %v646_v48 }
 0x1f2   :  { %v606_v61 = vmax.f32 %v472_v58, 0.0  ;;  %2349 = vmatpush3.bf16.msra.mxu1 %v2346_v31  ;;  %v1912_v62 = vpop.f32.mrb[40].mxu1 }
 0x1f3   :  { %v487_v0 = vadd.f32 %v1912_v62, %v2934_v44  ;;  %v481_v1 = vpop.f32.mrb[41].mxu1  ;;  %2351 = vmatprep.subr.bf16.mxu1 %v2350_v56 }
 0x1f4   :  { %1981 = vmatprep.mubr.f32.mxu1 %v606_v61  ;;  %v482_v5 = vadd.f32 %v2934_v44, %v481_v1 }
 0x1f5   :  { %1982 = vmatmul.mubr.f32.gmra.mrb[66].mxu1 %v607_v63  ;;  %v609_v11 = vmax.f32 %v487_v0, 0.0  ;;  %v447_v63 = vadd.f32 %v2925_v40, %v2934_v44  ;;  %v2434_v0 = vpack.c.bf16 %v955_v60, %v954_v59  ;;  %v457_v40 = vadd.f32 %v2927_v42, %v2934_v44  ;;  %v1059_v59 = vld [vmem:[#allocation2 + $0x258] sm:$0xff] }
 0x1f6   :  { %2353 = vmatpush3.bf16.msra.mxu1 %v2350_v56  ;;  %2016 = vmatprep.mubr.f32.mxu1 %v600_v4  ;;  %v608_v9 = vmax.f32 %v482_v5, 0.0  ;;  %v1915_v10 = vpop.f32.mrb[42].mxu1  ;;  %v2430_v56 = vpack.c.bf16 %v953_v53, %v952_v52  ;;  %v956_v4 = vld [vmem:[#allocation2 + $0x1f0] sm:$0xff]  ;;  %v957_v5 = vld [vmem:[#allocation2 + $0x1f8] sm:$0xff]  ;;  %v1056_v53 = vld [vmem:[#allocation2 + $0x240] sm:$0xff] }
 0x1f7   :  { %2355 = vmatprep.subr.bf16.mxu1 %v2354_v2  ;;  %v497_v15 = vadd.f32 %v1915_v10, %v2934_v44  ;;  %v491_v16 = vpop.f32.mrb[43].mxu1  ;;  %v601_v8 = vmax.f32 %v447_v63, 0.0  ;;  %v603_v17 = vmax.f32 %v457_v40, 0.0  ;;  %v1061_v63 = vld [vmem:[#allocation2 + $0x268] sm:$0xff]  ;;  %v1157_v40 = vld [vmem:[#allocation2 + $0x298] sm:$0xff] }
 0x1f8   :  { %2054 = vmatprep.mubr.f32.mxu0 %v608_v9  ;;  %v492_v19 = vadd.f32 %v2934_v44, %v491_v16  ;;  %v2438_v9 = vpack.c.bf16 %v957_v5, %v956_v4  ;;  %v1155_v5 = vld [vmem:[#allocation2 + $0x288] sm:$0xff] }
 0x1f9   :  { %2055 = vmatmul.mubr.f32.vlgmr.msra.gmra.mrb[0].mxu0 %v609_v11  ;;  %v611_v20 = vmax.f32 %v497_v15, 0.0 }
 0x1fa   :  { %2357 = vmatpush3.bf16.msra.mxu1 %v2354_v2  ;;  %2413 = vmatpush3.bf16.msra.mxu0 %v2410_v39  ;;  %v610_v21 = vmax.f32 %v492_v19, 0.0  ;;  %v2945_v22 = vpop.f32.mrb[44].mxu1  ;;  %v950_v39 = vld [vmem:[#allocation2 + $0x1c0] sm:$0xff] }
 0x1fb   :  { %2359 = vmatprep.subr.bf16.mxu1 %v2358_v12  ;;  %2415 = vmatprep.subr.bf16.mxu0 %v2414_v13  ;;  %v501_v26 = vpop.f32.mrb[45].mxu1  ;;  %v2426_v47 = vpack.c.bf16 %v951_v41, %v950_v39  ;;  %v507_v42 = vadd.f32 %v2945_v22, %v2934_v44 }
 0x1fc   :  { %v502_v31 = vadd.f32 %v2934_v44, %v501_v26  ;;  %2057 = vmatprep.mubr.f32.mxu0 %v610_v21  ;;  %v1051_v21 = vld [vmem:[#allocation2 + $0x218] sm:$0xff] }
 0x1fd   :  { %2058 = vmatmul.mubr.f32.gmra.mrb[2].mxu0 %v611_v20  ;;  %v1050_v20 = vld [vmem:[#allocation2 + $0x210] sm:$0xff]  ;;  %v613_v27 = vmax.f32 %v507_v42, 0.0 }
 0x1fe   :  { %2361 = vmatpush3.bf16.msra.mxu1 %v2358_v12  ;;  %2417 = vmatpush3.bf16.msra.mxu0 %v2414_v13  ;;  %v612_v32 = vmax.f32 %v502_v31, 0.0  ;;  %v2948_v33 = vpop.f32.mrb[46].mxu1  ;;  %v602_v12 = vmax.f32 %v452_v3, 0.0  ;;  %v1049_v13 = vld [vmem:[#allocation2 + $0x208] sm:$0xff]  ;;  %v2446_v29 = vpack.c.bf16 %v1051_v21, %v1050_v20  ;;  %v1063_v3 = vld [vmem:[#allocation2 + $0x278] sm:$0xff]  ;;  %v1160_v42 = vld [vmem:[#allocation2 + $0x2b0] sm:$0xff] }
 0x1ff   :  { %2363 = vmatprep.subr.bf16.mxu1 %v2362_v23  ;;  %2419 = vmatprep.subr.bf16.mxu0 %v2418_v24  ;;  %v511_v37 = vpop.f32.mrb[47].mxu1  ;;  %v2442_v18 = vpack.c.bf16 %v1049_v13, %v1048_v43  ;;  %v1158_v43 = vld [vmem:[#allocation2 + $0x2a0] sm:$0xff]  ;;  %v1159_v13 = vld [vmem:[#allocation2 + $0x2a8] sm:$0xff]  ;;  %v1164_v21 = vld [vmem:[#allocation2 + $0x2d0] sm:$0xff] }
 0x200   :  { %2092 = vmatprep.mubr.f32.mxu0 %v612_v32  ;;  %v512_v15 = vadd.f32 %v2934_v44, %v511_v37  ;;  %v1052_v32 = vld [vmem:[#allocation2 + $0x220] sm:$0xff] }
 0x202   :  { %2365 = vmatpush3.bf16.msra.mxu1 %v2362_v23  ;;  %2421 = vmatpush3.bf16.msra.mxu0 %v2418_v24  ;;  %v1924_v45 = vpop.f32.mrb[48].mxu1  ;;  %v517_v24 = vadd.f32 %v2948_v33, %v2934_v44  ;;  %v614_v25 = vmax.f32 %v512_v15, 0.0 }
 0x203   :  { %2367 = vmatprep.subr.bf16.mxu1 %v2366_v34  ;;  %2423 = vmatprep.subr.bf16.mxu0 %v2422_v35  ;;  %v2951_v49 = vadd.f32 %v1924_v45, %v2934_v44  ;;  %v521_v50 = vpop.f32.mrb[49].mxu1  ;;  %v1054_v45 = vld [vmem:[#allocation2 + $0x230] sm:$0xff] }
 0x204   :  { %v522_v26 = vadd.f32 %v2934_v44, %v521_v50  ;;  %v615_v36 = vmax.f32 %v517_v24, 0.0  ;;  %v1166_v24 = vld [vmem:[#allocation2 + $0x2e0] sm:$0xff] }
 0x206   :  { %2369 = vmatpush3.bf16.msra.mxu1 %v2366_v34  ;;  %2425 = vmatpush3.bf16.msra.mxu0 %v2422_v35  ;;  %v1927_v54 = vpop.f32.mrb[50].mxu1  ;;  %v1053_v34 = vld [vmem:[#allocation2 + $0x228] sm:$0xff]  ;;  %v616_v33 = vmax.f32 %v522_v26, 0.0 }
 0x207   :  { %2371 = vmatprep.subr.bf16.mxu1 %v2370_v46  ;;  %2427 = vmatprep.subr.bf16.mxu0 %v2426_v47  ;;  %v2954_v57 = vadd.f32 %v1927_v54, %v2934_v44  ;;  %v531_v58 = vpop.f32.mrb[51].mxu1  ;;  %v2450_v38 = vpack.c.bf16 %v1053_v34, %v1052_v32  ;;  %v1057_v54 = vld [vmem:[#allocation2 + $0x248] sm:$0xff] }
 0x208   :  { %v2957_v61 = vadd.f32 %v2934_v44, %v531_v58  ;;  %v1058_v58 = vld [vmem:[#allocation2 + $0x250] sm:$0xff]  ;;  %v1261_v32 = vld [vmem:[#allocation2 + $0x308] sm:$0xff] }
 0x209   :  { %v2462_v60 = vpack.c.bf16 %v1059_v59, %v1058_v58  ;;  %v619_v15 = vmax.f32 %v2954_v57, 0.0  ;;  %v1165_v57 = vld [vmem:[#allocation2 + $0x2d8] sm:$0xff]  ;;  %v1270_v59 = vld [vmem:[#allocation2 + $0x350] sm:$0xff] }
 0x20a   :  { %2373 = vmatpush3.bf16.msra.mxu1 %v2370_v46  ;;  %2429 = vmatpush3.bf16.msra.mxu0 %v2426_v47  ;;  %v1930_v62 = vpop.f32.mrb[52].mxu1  ;;  %v1055_v46 = vld [vmem:[#allocation2 + $0x238] sm:$0xff] }
 0x20b   :  { %2375 = vmatprep.subr.bf16.mxu1 %v2374_v55  ;;  %2431 = vmatprep.subr.bf16.mxu0 %v2430_v56  ;;  %v2962_v1 = vadd.f32 %v1930_v62, %v2934_v44  ;;  %v541_v2 = vpop.f32.mrb[53].mxu1  ;;  %v2454_v50 = vpack.c.bf16 %v1055_v46, %v1054_v45  ;;  %v1060_v62 = vld [vmem:[#allocation2 + $0x260] sm:$0xff]  ;;  %v1265_v46 = vld [vmem:[#allocation2 + $0x328] sm:$0xff] }
 0x20c   :  { %v2967_v6 = vadd.f32 %v2934_v44, %v541_v2  ;;  %v1062_v2 = vld [vmem:[#allocation2 + $0x270] sm:$0xff]  ;;  %v1264_v45 = vld [vmem:[#allocation2 + $0x320] sm:$0xff] }
 0x20d   :  { %v2470_v4 = vpack.c.bf16 %v1063_v3, %v1062_v2  ;;  %v1275_v2 = vld [vmem:[#allocation2 + $0x378] sm:$0xff] }
 0x20e   :  { %2377 = vmatpush3.bf16.msra.mxu1 %v2374_v55  ;;  %2433 = vmatpush3.bf16.msra.mxu0 %v2430_v56  ;;  %v1933_v7 = vpop.f32.mrb[54].mxu1  ;;  %v2458_v56 = vpack.c.bf16 %v1057_v54, %v1056_v53  ;;  %v1266_v53 = vld [vmem:[#allocation2 + $0x330] sm:$0xff]  ;;  %v1267_v54 = vld [vmem:[#allocation2 + $0x338] sm:$0xff] }
 0x20f   :  { %2435 = vmatprep.subr.bf16.mxu0 %v2434_v0  ;;  %v2972_v10 = vadd.f32 %v1933_v7, %v2934_v44  ;;  %v551_v11 = vpop.f32.mrb[55].mxu1 }
 0x210   :  { %v2975_v14 = vadd.f32 %v2934_v44, %v551_v11  ;;  %v617_v11 = vmax.f32 %v2951_v49, 0.0 }
 0x211   :  { %2017 = vmatmul.mubr.f32.vlgmr.msra.gmra.mrb[64].mxu1 %v601_v8  ;;  %v1156_v8 = vld [vmem:[#allocation2 + $0x290] sm:$0xff] }
 0x212   :  { %2019 = vmatprep.mubr.f32.mxu1 %v602_v12  ;;  %2437 = vmatpush3.bf16.msra.mxu0 %v2434_v0  ;;  %v1936_v16 = vpop.f32.mrb[56].mxu1  ;;  %v2466_v0 = vpack.c.bf16 %v1061_v63, %v1060_v62  ;;  %v2478_v12 = vpack.c.bf16 %v1157_v40, %v1156_v8  ;;  %v1273_v62 = vld [vmem:[#allocation2 + $0x368] sm:$0xff]  ;;  %v1369_v8 = vld [vmem:[#allocation2 + $0x398] sm:$0xff] }
 0x213   :  { %2439 = vmatprep.subr.bf16.mxu0 %v2438_v9  ;;  %v2981_v28 = vadd.f32 %v1936_v16, %v2934_v44  ;;  %v561_v19 = vpop.f32.mrb[57].mxu1  ;;  %v620_v16 = vmax.f32 %v2967_v6, 0.0  ;;  %v2494_v6 = vpack.c.bf16 %v1165_v57, %v1164_v21  ;;  %v1380_v57 = vld [vmem:[#allocation2 + $0x3f0] sm:$0xff] }
 0x214   :  { %v2984_v23 = vadd.f32 %v2934_v44, %v561_v19  ;;  %v1163_v19 = vld [vmem:[#allocation2 + $0x2c8] sm:$0xff] }
 0x215   :  { %2020 = vmatmul.mubr.f32.gmra.mrb[66].mxu1 %v603_v17  ;;  %v2482_v17 = vpack.c.bf16 %v1159_v13, %v1158_v43  ;;  %v1371_v43 = vld [vmem:[#allocation2 + $0x3a8] sm:$0xff] }
 0x216   :  { %2441 = vmatpush3.bf16.msra.mxu0 %v2438_v9  ;;  %v1939_v22 = vpop.f32.mrb[58].mxu1  ;;  %v618_v9 = vmax.f32 %v2957_v61, 0.0  ;;  %v1162_v61 = vld [vmem:[#allocation2 + $0x2c0] sm:$0xff] }
 0x217   :  { %2443 = vmatprep.subr.bf16.mxu0 %v2442_v18  ;;  %v2990_v30 = vadd.f32 %v1939_v22, %v2934_v44  ;;  %v571_v31 = vpop.f32.mrb[59].mxu1  ;;  %v2490_v20 = vpack.c.bf16 %v1163_v19, %v1162_v61  ;;  %v1168_v22 = vld [vmem:[#allocation2 + $0x2f0] sm:$0xff]  ;;  %v1378_v19 = vld [vmem:[#allocation2 + $0x3e0] sm:$0xff] }
 0x218   :  { %v2993_v35 = vadd.f32 %v2934_v44, %v571_v31  ;;  %v1260_v31 = vld [vmem:[#allocation2 + $0x300] sm:$0xff]  ;;  %v1376_v61 = vld [vmem:[#allocation2 + $0x3d0] sm:$0xff] }
 0x219   :  { %2093 = vmatmul.mubr.f32.vlgmr.msra.gmra.mrb[0].mxu0 %v613_v27  ;;  %v1169_v27 = vld [vmem:[#allocation2 + $0x2f8] sm:$0xff]  ;;  %v2506_v34 = vpack.c.bf16 %v1261_v32, %v1260_v31  ;;  %v627_v13 = vmax.f32 %v2990_v30, 0.0 }
 0x21a   :  { %2445 = vmatpush3.bf16.msra.mxu0 %v2442_v18  ;;  %2095 = vmatprep.mubr.f32.mxu0 %v614_v25  ;;  %v1942_v37 = vpop.f32.mrb[60].mxu1  ;;  %v1161_v18 = vld [vmem:[#allocation2 + $0x2b8] sm:$0xff]  ;;  %v1167_v25 = vld [vmem:[#allocation2 + $0x2e8] sm:$0xff]  ;;  %v626_v40 = vmax.f32 %v2993_v35, 0.0  ;;  %v1374_v35 = vld [vmem:[#allocation2 + $0x3c0] sm:$0xff] }
 0x21b   :  { %2447 = vmatprep.subr.bf16.mxu0 %v2446_v29  ;;  %v2996_v39 = vadd.f32 %v1942_v37, %v2934_v44  ;;  %v581_v41 = vpop.f32.mrb[61].mxu1  ;;  %v2486_v49 = vpack.c.bf16 %v1161_v18, %v1160_v42  ;;  %v2498_v26 = vpack.c.bf16 %v1167_v25, %v1166_v24  ;;  %v622_v37 = vmax.f32 %v2975_v14, 0.0  ;;  %v1268_v14 = vld [vmem:[#allocation2 + $0x340] sm:$0xff]  ;;  %v1373_v42 = vld [vmem:[#allocation2 + $0x3b8] sm:$0xff]  ;;  %v1375_v18 = vld [vmem:[#allocation2 + $0x3c8] sm:$0xff] }
 0x21c   :  { %v2999_v47 = vadd.f32 %v2934_v44, %v581_v41  ;;  %v1377_v30 = vld [vmem:[#allocation2 + $0x3d8] sm:$0xff] }
 0x21d   :  { %2096 = vmatmul.mubr.f32.gmra.mrb[2].mxu0 %v615_v36  ;;  %v1262_v36 = vld [vmem:[#allocation2 + $0x310] sm:$0xff] }
 0x21e   :  { %2449 = vmatpush3.bf16.msra.mxu0 %v2446_v29  ;;  %2130 = vmatprep.mubr.f32.mxu0 %v616_v33  ;;  %v1945_v48 = vpop.f32.mrb[62].mxu1  ;;  %v2502_v29 = vpack.c.bf16 %v1169_v27, %v1168_v22  ;;  %v1263_v33 = vld [vmem:[#allocation2 + $0x318] sm:$0xff] }
 0x21f   :  { %2451 = vmatprep.subr.bf16.mxu0 %v2450_v38  ;;  %v3002_v51 = vadd.f32 %v1945_v48, %v2934_v44  ;;  %v591_v52 = vpop.f32.mrb[63].mxu1  ;;  %v2510_v41 = vpack.c.bf16 %v1263_v33, %v1262_v36  ;;  %v623_v48 = vmax.f32 %v2972_v10, 0.0  ;;  %v1271_v10 = vld [vmem:[#allocation2 + $0x358] sm:$0xff] }
 0x220   :  { %v3005_v55 = vadd.f32 %v2934_v44, %v591_v52  ;;  %v1154_v44 = vld [vmem:[#allocation2 + $0x280] sm:$0xff]  ;;  %v2514_v52 = vpack.c.bf16 %v1265_v46, %v1264_v45 }
 0x221   :  { %v2474_v7 = vpack.c.bf16 %v1155_v5, %v1154_v44  ;;  %v1367_v44 = vld [vmem:[#allocation2 + $0x388] sm:$0xff]  ;;  %v631_v22 = vmax.f32 %v3002_v51, 0.0 }
 0x222   :  { %2453 = vmatpush3.bf16.msra.mxu0 %v2450_v38  ;;  %v621_v38 = vmax.f32 %v2962_v1, 0.0  ;;  %v2518_v1 = vpack.c.bf16 %v1267_v54, %v1266_v53  ;;  %v630_v25 = vmax.f32 %v3005_v55, 0.0 }
 0x223   :  { %2455 = vmatprep.subr.bf16.mxu0 %v2454_v50 }
 0x226   :  { %2457 = vmatpush3.bf16.msra.mxu0 %v2454_v50  ;;  %v624_v50 = vmax.f32 %v2984_v23, 0.0  ;;  %v2526_v23 = vpack.c.bf16 %v1271_v10, %v1270_v59 }
 0x227   :  { %2459 = vmatprep.subr.bf16.mxu0 %v2458_v56 }
 0x22a   :  { %2461 = vmatpush3.bf16.msra.mxu0 %v2458_v56  ;;  %v1269_v56 = vld [vmem:[#allocation2 + $0x348] sm:$0xff] }
 0x22b   :  { %2463 = vmatprep.subr.bf16.mxu0 %v2462_v60  ;;  %v2522_v58 = vpack.c.bf16 %v1269_v56, %v1268_v14 }
 0x22e   :  { %2465 = vmatpush3.bf16.msra.mxu0 %v2462_v60  ;;  %v1272_v60 = vld [vmem:[#allocation2 + $0x360] sm:$0xff] }
 0x22f   :  { %2467 = vmatprep.subr.bf16.mxu0 %v2466_v0  ;;  %v2530_v63 = vpack.c.bf16 %v1273_v62, %v1272_v60 }
 0x232   :  { %2469 = vmatpush3.bf16.msra.mxu0 %v2466_v0  ;;  %v1274_v0 = vld [vmem:[#allocation2 + $0x370] sm:$0xff] }
 0x233   :  { %2471 = vmatprep.subr.bf16.mxu0 %v2470_v4  ;;  %v2534_v3 = vpack.c.bf16 %v1275_v2, %v1274_v0 }
 0x236   :  { %2473 = vmatpush3.bf16.msra.mxu0 %v2470_v4  ;;  %v1366_v4 = vld [vmem:[#allocation2 + $0x380] sm:$0xff] }
 0x237   :  { %2475 = vmatprep.subr.bf16.mxu0 %v2474_v7  ;;  %v2538_v5 = vpack.c.bf16 %v1367_v44, %v1366_v4 }
 0x239   :  { %2131 = vmatmul.mubr.f32.vlgmr.msra.gmra.mrb[0].mxu0 %v617_v11 }
 0x23a   :  { %2477 = vmatpush3.bf16.msra.mxu0 %v2474_v7  ;;  %2133 = vmatprep.mubr.f32.mxu0 %v618_v9  ;;  %v1368_v7 = vld [vmem:[#allocation2 + $0x390] sm:$0xff]  ;;  %v625_v9 = vmax.f32 %v2981_v28, 0.0 }
 0x23b   :  { %2479 = vmatprep.subr.bf16.mxu0 %v2478_v12  ;;  %v2542_v11 = vpack.c.bf16 %v1369_v8, %v1368_v7 }
 0x23d   :  { %2134 = vmatmul.mubr.f32.gmra.mrb[2].mxu0 %v619_v15  ;;  %v628_v15 = vmax.f32 %v2999_v47, 0.0  ;;  %v2558_v47 = vpack.c.bf16 %v1377_v30, %v1376_v61 }
 0x23e   :  { %2481 = vmatpush3.bf16.msra.mxu0 %v2478_v12  ;;  %2168 = vmatprep.mubr.f32.mxu0 %v620_v16  ;;  %v1370_v12 = vld [vmem:[#allocation2 + $0x3a0] sm:$0xff] }
 0x23f   :  { %2483 = vmatprep.subr.bf16.mxu0 %v2482_v17  ;;  %v2546_v16 = vpack.c.bf16 %v1371_v43, %v1370_v12 }
 0x242   :  { %2485 = vmatpush3.bf16.msra.mxu0 %v2482_v17  ;;  %v1372_v17 = vld [vmem:[#allocation2 + $0x3b0] sm:$0xff] }
 0x243   :  { %2487 = vmatprep.subr.bf16.mxu0 %v2486_v49  ;;  %v2550_v28 = vpack.c.bf16 %v1373_v42, %v1372_v17 }
 0x246   :  { %2489 = vmatpush3.bf16.msra.mxu0 %v2486_v49  ;;  %v2554_v49 = vpack.c.bf16 %v1375_v18, %v1374_v35 }
 0x247   :  { %2491 = vmatprep.subr.bf16.mxu0 %v2490_v20 }
 0x24a   :  { %2493 = vmatpush3.bf16.msra.mxu0 %v2490_v20  ;;  %v1379_v20 = vld [vmem:[#allocation2 + $0x3e8] sm:$0xff] }
 0x24b   :  { %2495 = vmatprep.subr.bf16.mxu0 %v2494_v6  ;;  %v2562_v21 = vpack.c.bf16 %v1379_v20, %v1378_v19 }
 0x24e   :  { %2497 = vmatpush3.bf16.msra.mxu0 %v2494_v6  ;;  %v1381_v6 = vld [vmem:[#allocation2 + $0x3f8] sm:$0xff] }
 0x24f   :  { %2499 = vmatprep.subr.bf16.mxu0 %v2498_v26  ;;  %v2566_v24 = vpack.c.bf16 %v1381_v6, %v1380_v57 }
 0x252   :  { %2501 = vmatpush3.bf16.msra.mxu0 %v2498_v26  ;;  %v629_v26 = vmax.f32 %v2996_v39, 0.0 }
 0x253   :  { %2503 = vmatprep.subr.bf16.mxu0 %v2502_v29 }
 0x256   :  { %2505 = vmatpush3.bf16.msra.mxu0 %v2502_v29 }
 0x257   :  { %2507 = vmatprep.subr.bf16.mxu0 %v2506_v34 }
 0x259   :  { %2169 = vmatmul.mubr.f32.vlgmr.msra.gmra.mrb[0].mxu0 %v621_v38 }
 0x25a   :  { %2509 = vmatpush3.bf16.msra.mxu0 %v2506_v34  ;;  %2171 = vmatprep.mubr.f32.mxu0 %v622_v37  ;;  %v1529_v37 = vld [vmem:[%s3043_s6] ss:$0 sm:$0xff] }
 0x25b   :  { %2511 = vmatprep.subr.bf16.mxu0 %v2510_v41 }
 0x25d   :  { %2172 = vmatmul.mubr.f32.gmra.mrb[2].mxu0 %v623_v48 }
 0x25e   :  { %2513 = vmatpush3.bf16.msra.mxu0 %v2510_v41  ;;  %2206 = vmatprep.mubr.f32.mxu0 %v624_v50 }
 0x25f   :  { %2515 = vmatprep.subr.bf16.mxu0 %v2514_v52 }
 0x262   :  { %2517 = vmatpush3.bf16.msra.mxu0 %v2514_v52 }
 0x263   :  { %2519 = vmatprep.subr.bf16.mxu0 %v2518_v1 }
 0x266   :  { %2521 = vmatpush3.bf16.msra.mxu0 %v2518_v1 }
 0x267   :  { %2523 = vmatprep.subr.bf16.mxu0 %v2522_v58 }
 0x26a   :  { %2525 = vmatpush3.bf16.msra.mxu0 %v2522_v58 }
 0x26b   :  { %2527 = vmatprep.subr.bf16.mxu0 %v2526_v23 }
 0x26e   :  { %2529 = vmatpush3.bf16.msra.mxu0 %v2526_v23 }
 0x26f   :  { %2531 = vmatprep.subr.bf16.mxu0 %v2530_v63 }
 0x272   :  { %2533 = vmatpush3.bf16.msra.mxu0 %v2530_v63 }
 0x273   :  { %2535 = vmatprep.subr.bf16.mxu0 %v2534_v3 }
 0x276   :  { %2537 = vmatpush3.bf16.msra.mxu0 %v2534_v3 }
 0x277   :  { %2539 = vmatprep.subr.bf16.mxu0 %v2538_v5 }
 0x279   :  { %2207 = vmatmul.mubr.f32.vlgmr.msra.gmra.mrb[0].mxu0 %v625_v9 }
 0x27a   :  { %2541 = vmatpush3.bf16.msra.mxu0 %v2538_v5  ;;  %2209 = vmatprep.mubr.f32.mxu0 %v626_v40 }
 0x27b   :  { %2543 = vmatprep.subr.bf16.mxu0 %v2542_v11 }
 0x27d   :  { %2210 = vmatmul.mubr.f32.gmra.mrb[2].mxu0 %v627_v13 }
 0x27e   :  { %2545 = vmatpush3.bf16.msra.mxu0 %v2542_v11  ;;  %2244 = vmatprep.mubr.f32.mxu0 %v628_v15 }
 0x27f   :  { %2547 = vmatprep.subr.bf16.mxu0 %v2546_v16 }
 0x282   :  { %2549 = vmatpush3.bf16.msra.mxu0 %v2546_v16 }
 0x283   :  { %2551 = vmatprep.subr.bf16.mxu0 %v2550_v28 }
 0x286   :  { %2553 = vmatpush3.bf16.msra.mxu0 %v2550_v28 }
 0x287   :  { %2555 = vmatprep.subr.bf16.mxu0 %v2554_v49 }
 0x28a   :  { %2557 = vmatpush3.bf16.msra.mxu0 %v2554_v49 }
 0x28b   :  { %2559 = vmatprep.subr.bf16.mxu0 %v2558_v47 }
 0x28e   :  { %2561 = vmatpush3.bf16.msra.mxu0 %v2558_v47 }
 0x28f   :  { %2563 = vmatprep.subr.bf16.mxu0 %v2562_v21 }
 0x292   :  { %2565 = vmatpush3.bf16.msra.mxu0 %v2562_v21 }
 0x293   :  { %2567 = vmatprep.subr.bf16.mxu0 %v2566_v24 }
 0x296   :  { %2569 = vmatpush3.bf16.msra.mxu0 %v2566_v24 }
 0x299   :  { %2245 = vmatmul.mubr.f32.vlgmr.msra.gmra.mrb[0].mxu0 %v629_v26 }
 0x29a   :  { %2247 = vmatprep.mubr.f32.mxu0 %v630_v25 }
 0x29d   :  { %2248 = vmatmul.mubr.f32.gmra.mrb[2].mxu0 %v631_v22 }
 0x2e4   :  { %v2018_v27 = vpop.f32.mrb[64].mxu1 }
 0x2e5   :  { %v816_v29 = vpop.f32.mrb[65].mxu1 }
 0x2e8   :  { %v2021_v31 = vpop.f32.mrb[66].mxu1 }
 0x2e9   :  { %v826_v32 = vpop.f32.mrb[67].mxu1 }
 0x36c   :  { %v2246_v34 = vpop.f32.mrb[0].mxu0 }
 0x36d   :  { %v2570_v36 = vadd.f32 %v2246_v34, %v2018_v27  ;;  %v1448_v33 = vpop.f32.mrb[1].mxu0 }
 0x36e   :  { %v2571_v55 = vadd.f32 %v1448_v33, %v816_v29 }
 0x36f   :  { %v1479_v51 = vadd.f32 %v2570_v36, %v1529_v37 }
 0x370   :  { %v2249_v38 = vpop.f32.mrb[2].mxu0  ;;  %v1478_v41 = vadd.f32 %v2571_v55, %v1529_v37 }
 0x371   :  { %v2572_v39 = vadd.f32 %v2249_v38, %v2021_v31  ;;  %v1458_v45 = vpop.f32.mrb[3].mxu0 }
 0x372   :  { %v2573_v46 = vadd.f32 %v1458_v45, %v826_v32  ;;  %1482 = vmax.xlane.f32.xlu0 %v1478_v41 }
 0x373   :  { %v1481_v50 = vadd.f32 %v2572_v39, %v1529_v37 }
 0x374   :  { %v1480_v48 = vadd.f32 %v2573_v46, %v1529_v37 }
 0x376   :  { %1484 = vmax.xlane.f32.xlu0 %v1479_v51  ;;  %1486 = vmax.xlane.f32.xlu1 %v1480_v48 }
 0x37a   :  { %1488 = vmax.xlane.f32.xlu1 %v1481_v50 }
 0x3ff   :  { %v1483_v52 = vpop.xlane.xlu0 %1482 }
 0x400   :  { %v1490_v53 = vsub.f32 %v1478_v41, %v1483_v52 }
 0x402   :  { %v1494_v54 = vmul.f32 1.442695, %v1490_v53 }
 0x403   :  { %v1485_v1 = vpop.xlane.xlu0 %1484  ;;  %v1487_v14 = vpop.xlane.xlu1 %1486 }
 0x404   :  { %2601 = vpow2.f32 %v1494_v54  ;;  %v1491_v56 = vsub.f32 %v1479_v51, %v1485_v1  ;;  %v1492_v58 = vsub.f32 %v1480_v48, %v1487_v14 }
 0x406   :  { %v1496_v59 = vmul.f32 1.442695, %v1491_v56  ;;  %v1498_v10 = vmul.f32 1.442695, %v1492_v58 }
 0x407   :  { %v1489_v23 = vpop.xlane.xlu1 %1488 }
 0x408   :  { %2603 = vpow2.f32 %v1496_v59  ;;  %v1493_v60 = vsub.f32 %v1481_v50, %v1489_v23 }
 0x409   :  { %2605 = vpow2.f32 %v1498_v10 }
 0x40a   :  { %v1500_v62 = vmul.f32 1.442695, %v1493_v60 }
 0x40c   :  { %2607 = vpow2.f32 %v1500_v62 }
 0x40e   :  { %v2602_v63 = vpop.eup %2601 }
 0x40f   :  { %1502 = vadd.xlane.f32.xlu0 %v2602_v63 }
 0x412   :  { %v2604_v0 = vpop.eup %2603 }
 0x413   :  { %v2606_v2 = vpop.eup %2605  ;;  %1504 = vadd.xlane.f32.xlu1 %v2604_v0 }
 0x414   :  { %1506 = vadd.xlane.f32.xlu0 %v2606_v2 }
 0x416   :  { %v2608_v3 = vpop.eup %2607 }
 0x417   :  { %1508 = vadd.xlane.f32.xlu1 %v2608_v3 }
 0x49c   :  { %v1503_v4 = vpop.xlane.xlu0 %1502 }
 0x49d   :  { %2609 = vrcp.f32 %v1503_v4 }
 0x4a0   :  { %v1505_v44 = vpop.xlane.xlu1 %1504 }
 0x4a1   :  { %v1507_v5 = vpop.xlane.xlu0 %1506  ;;  %2611 = vrcp.f32 %v1505_v44 }
 0x4a2   :  { %2613 = vrcp.f32 %v1507_v5 }
 0x4a4   :  { %v1509_v7 = vpop.xlane.xlu1 %1508 }
 0x4a5   :  { %2615 = vrcp.f32 %v1509_v7 }
 0x4a7   :  { %v2610_v8 = vpop.eup %2609 }
 0x4a8   :  { %v1511_v40 = vmul.f32 %v2610_v8, %v2602_v63 }
 0x4aa   :  { %1518 = vst [vmem:[%s3044_s7] sm:$0xff] %v1511_v40 }
 0x4ab   :  { %v2612_v9 = vpop.eup %2611 }
 0x4ac   :  { %v2614_v11 = vpop.eup %2613  ;;  %v1513_v12 = vmul.f32 %v2612_v9, %v2604_v0 }
 0x4ad   :  { %v1515_v43 = vmul.f32 %v2614_v11, %v2606_v2 }
 0x4ae   :  { %1519 = vst [vmem:[%s3044_s7 + $0x8] sm:$0xff] %v1513_v12 }
 0x4af   :  { %v2616_v13 = vpop.eup %2615  ;;  %1520 = vst [vmem:[%s3044_s7 + $0x10] sm:$0xff] %v1515_v43 }
 0x4b0   :  { %v1517_v15 = vmul.f32 %v2616_v13, %v2608_v3 }
 0x4b2   :  { %1521 = vst [vmem:[%s3044_s7 + $0x18] sm:$0xff] %v1517_v15 }
 0x4b3   :  { %1526 = vsyncpa [#allocation3], 1 }

</bundles_post_ra>
